<compile_context>
chip_gen: v6e
topology: v6e:2x2x1
jax: 0.10.0
libtpu: 0.0.40
codegen_flags: <defaults>
</compile_context>

<pallas_src>
import functools
import math

import jax
import jax.numpy as jnp
from jax import lax
from jax.experimental import pallas as pl
from jax.experimental.pallas import tpu as pltpu


_NEG_PAD = -1e9   # bias for padded logit columns: exp underflows to exactly 0


# ---------------------------------------------------------------------------
# Kernel 1: the sequential recurrence (the only truly serial work).
# ---------------------------------------------------------------------------
def rnn_recurrence_kernel(xh_ref, whh_ref, h0_ref, hprev_ref, hfin_ref, h_scr):
    """One grid step = one (batch block, time chunk).

    xh_ref:    [TB, BB, H] f32   input projection chunk (bias already folded in)
    whh_ref:   [H, H]      bf16  hidden->hidden weight (VMEM-resident)
    h0_ref:    [BB, H]     bf16  initial hidden for this batch block (resident)
    hprev_ref: [TB, BB, H] bf16  OUT: hidden state entering each step
    hfin_ref:  [BB, H]     f32   OUT: final hidden state (resident)
    h_scr:     [BB, H]     bf16  hidden carry (persists across time chunks)
    """
    t_chunk = pl.program_id(1)

    @pl.when(t_chunk == 0)
    def _():
        h_scr[...] = h0_ref[...]

    tb = xh_ref.shape[0]

    def step(t, carry):
        h = h_scr[...]                                   # [BB, H] bf16
        hprev_ref[t] = h                                 # lane-dense (H=128) store
        new_h = xh_ref[t] + jnp.dot(h, whh_ref[...],
                                    preferred_element_type=jnp.float32)
        h_scr[...] = new_h.astype(h_scr.dtype)
        return carry

    lax.fori_loop(0, tb, step, 0, unroll=True)

    hfin_ref[...] = h_scr[...].astype(hfin_ref.dtype)


# ---------------------------------------------------------------------------
# Kernel 2: deferred output projection + log-softmax, batched over all steps.
# ---------------------------------------------------------------------------
def rnn_output_kernel(xo_ref, hprev_ref, who_ref, out_ref):
    """
    xo_ref:    [R, Opad] f32   x @ Wx_o + b_o   (padded columns hold -1e9)
    hprev_ref: [R, H]    bf16  hidden entering each step (flattened T*B rows)
    who_ref:   [H, Opad] bf16  hidden->output weight (zero-padded columns)
    out_ref:   [R, Opad] f32   log-probs (padded columns sliced off by caller)
    """
    z = xo_ref[...] + jnp.dot(hprev_ref[...], who_ref[...],
                              preferred_element_type=jnp.float32)
    m = jnp.max(z, axis=-1, keepdims=True)
    s = z - m
    lse = jnp.log(jnp.sum(jnp.exp(s), axis=-1, keepdims=True))
    out_ref[...] = s - lse


# ---------------------------------------------------------------------------
# One-time parameter packing (hoisted out of any per-step / per-call path).
# ---------------------------------------------------------------------------
def prepare_params(w_i2h, b_i2h, w_i2o, b_i2o):
    """PyTorch layout in:  w_i2h [H, I+H], b_i2h [H], w_i2o [O, I+H], b_i2o [O].

    Packed out:
      wx   [I, H+Opad] bf16  x-projection weight (i2h cols ++ padded i2o cols)
      bias [1, H+Opad] f32   b_i2h ++ b_i2o (padded cols = -1e9)
      wh_h [H, H]      bf16  hidden part of i2h
      wh_o [H, Opad]   bf16  hidden part of i2o (zero-padded to 128 lanes)
    """
    H = w_i2h.shape[0]
    O = w_i2o.shape[0]
    I = w_i2h.shape[1] - H
    Opad = max(128, ((O + 127) // 128) * 128)        # lane-dense logits width

    w_i2h_t = w_i2h.astype(jnp.float32).T                         # [I+H, H]
    w_i2o_t = jnp.pad(w_i2o.astype(jnp.float32).T,                # [I+H, Opad]
                      ((0, 0), (0, Opad - O)))

    wx = jnp.concatenate([w_i2h_t[:I], w_i2o_t[:I]], axis=1).astype(jnp.bfloat16)
    wh_h = w_i2h_t[I:].astype(jnp.bfloat16)                       # [H, H]
    wh_o = w_i2o_t[I:].astype(jnp.bfloat16)                       # [H, Opad]

    b_o_pad = jnp.concatenate([b_i2o.astype(jnp.float32),
                               jnp.full((Opad - O,), _NEG_PAD, jnp.float32)])
    bias = jnp.concatenate([b_i2h.astype(jnp.float32),
                            b_o_pad]).reshape(1, H + Opad)
    return wx, bias, wh_h, wh_o


# ---------------------------------------------------------------------------
# Wrapper: full-sequence forward (preferred entry point).
# ---------------------------------------------------------------------------
@functools.partial(jax.jit,
                   static_argnames=("output_size", "time_chunk", "batch_chunk"))
def rnn_forward_sequence(x_seq, hidden0, wx, bias, wh_h, wh_o, *,
                         output_size, time_chunk=8, batch_chunk=None):
    """x_seq [T,B,I], hidden0 [B,H] -> (log_probs [T,B,O] f32, final hidden [B,H] f32)."""
    T, B, I = x_seq.shape
    H = wh_h.shape[0]
    Opad = wh_o.shape[1]
    O = output_size

    tb = min(time_chunk, T)
    # For v7x (2 TensorCores) pass batch_chunk = B // 2 with B >= 16 to shard
    # the independent batch rows across cores; default keeps one batch block.
    bb = B if batch_chunk is None else batch_chunk
    assert T % tb == 0 and B % bb == 0

    x_bf16 = x_seq.astype(jnp.bfloat16)
    h0 = hidden0.astype(jnp.bfloat16)

    # ---- Hoisted, non-recurrent input projection: ONE big GEMM (M = T*B),
    #      bias folded in.  Runs at full MXU utilization in plain XLA. ----
    xproj = jnp.einsum("tbi,ij->tbj", x_bf16, wx,
                       preferred_element_type=jnp.float32) + bias
    xproj_h = xproj[..., :H]            # [T, B, H]    feeds the recurrence
    xproj_o = xproj[..., H:]            # [T, B, Opad] feeds the deferred output

    # ---- Pallas kernel 1: serial recurrence (weights resident, bf16 carry,
    #      tb timesteps per grid step, ~KB-scale DMAs). ----
    hprev, h_final = pl.pallas_call(
        rnn_recurrence_kernel,
        out_shape=(jax.ShapeDtypeStruct((T, B, H), jnp.bfloat16),
                   jax.ShapeDtypeStruct((B, H), jnp.float32)),
        grid_spec=pltpu.PrefetchScalarGridSpec(
            num_scalar_prefetch=0,
            grid=(B // bb, T // tb),
            in_specs=[
                pl.BlockSpec((tb, bb, H), lambda b, t: (t, b, 0)),   # xproj_h chunk
                pl.BlockSpec((H, H),      lambda b, t: (0, 0)),      # Wh_h resident
                pl.BlockSpec((bb, H),     lambda b, t: (b, 0)),      # h0 resident
            ],
            out_specs=(
                pl.BlockSpec((tb, bb, H), lambda b, t: (t, b, 0)),   # h_prev chunk
                pl.BlockSpec((bb, H),     lambda b, t: (b, 0)),      # final hidden
            ),
            scratch_shapes=[pltpu.VMEM((bb, H), jnp.bfloat16)],      # hidden carry
        ),
        compiler_params=pltpu.CompilerParams(
            dimension_semantics=("parallel", "arbitrary")),
    )(xproj_h, wh_h, h0)

    # ---- Pallas kernel 2: batched output projection + log-softmax over all
    #      T*B rows, 128-lane-padded output (unmasked full-width stores). ----
    rows = T * B
    row_blk = 512 if rows % 512 == 0 else rows          # tiny demo => one block
    logp_pad = pl.pallas_call(
        rnn_output_kernel,
        out_shape=jax.ShapeDtypeStruct((rows, Opad), jnp.float32),
        grid_spec=pltpu.PrefetchScalarGridSpec(
            num_scalar_prefetch=0,
            grid=(rows // row_blk,),
            in_specs=[
                pl.BlockSpec((row_blk, Opad), lambda r: (r, 0)),
                pl.BlockSpec((row_blk, H),    lambda r: (r, 0)),
                pl.BlockSpec((H, Opad),       lambda r: (0, 0)),     # Wh_o resident
            ],
            out_specs=pl.BlockSpec((row_blk, Opad), lambda r: (r, 0)),
        ),
        compiler_params=pltpu.CompilerParams(
            dimension_semantics=("parallel",)),
    )(xproj_o.reshape(rows, Opad), hprev.reshape(rows, H), wh_o)

    log_probs = logp_pad.reshape(T, B, Opad)[..., :O]
    return log_probs, h_final


def rnn_forward(x, hidden, wx, bias, wh_h, wh_o, *, output_size):
    """Single-step API matching RNN.forward(input, hidden) -> (output, hidden).
    (For sequences, always prefer rnn_forward_sequence: it fuses the loop.)"""
    out, new_hidden = rnn_forward_sequence(
        x[None], hidden, wx, bias, wh_h, wh_o,
        output_size=output_size, time_chunk=1)
    return out[0], new_hidden


def init_linear(key, out_features, in_features):
    """nn.Linear default init: U(-1/sqrt(fan_in), 1/sqrt(fan_in))."""
    kw, kb = jax.random.split(key)
    bound = 1.0 / math.sqrt(in_features)
    w = jax.random.uniform(kw, (out_features, in_features), jnp.float32, -bound, bound)
    b = jax.random.uniform(kb, (out_features,), jnp.float32, -bound, bound)
    return w, b


def ref_sequence(x_seq, hidden0, wx, bias, wh_h, wh_o, output_size):
    """Pure-JAX per-step reference with identical bf16-weight / f32-accum math."""
    H = wh_h.shape[0]
    O = output_size
    x_bf16 = x_seq.astype(jnp.bfloat16)
    h = hidden0.astype(jnp.bfloat16)
    outs = []
    for t in range(x_seq.shape[0]):
        xz = jnp.dot(x_bf16[t], wx, preferred_element_type=jnp.float32) + bias[0]
        logits = xz[:, H:H + O] + jnp.dot(h, wh_o[:, :O],
                                          preferred_element_type=jnp.float32)
        outs.append(jax.nn.log_softmax(logits, axis=-1))
        new_h = xz[:, :H] + jnp.dot(h, wh_h, preferred_element_type=jnp.float32)
        h = new_h.astype(jnp.bfloat16)
    return jnp.stack(outs), h.astype(jnp.float32)


if __name__ == "__main__":
    # Small shapes consistent with the module: n_hidden = 128 (from the spec),
    # batch padded from 1 to 8 to fill sublanes, short character sequence.
    T = 16
    batch = 8
    input_size = 64
    hidden_size = 128
    output_size = 32

    key = jax.random.PRNGKey(0)
    k_x, k_i2h, k_i2o = jax.random.split(key, 3)

    x_seq = jax.random.normal(k_x, (T, batch, input_size), jnp.float32)
    hidden0 = jnp.zeros((batch, hidden_size), jnp.float32)    # RNN.initHidden()

    w_i2h, b_i2h = init_linear(k_i2h, hidden_size, input_size + hidden_size)
    w_i2o, b_i2o = init_linear(k_i2o, output_size, input_size + hidden_size)

    # One-time parameter packing.
    wx, bias, wh_h, wh_o = prepare_params(w_i2h, b_i2h, w_i2o, b_i2o)

    # Fused full-sequence forward (pre-pass GEMM + 2 Pallas kernels).
    out, h_final = rnn_forward_sequence(x_seq, hidden0, wx, bias, wh_h, wh_o,
                                        output_size=output_size)
    jax.block_until_ready((out, h_final))
    assert out.shape == (T, batch, output_size)
    assert h_final.shape == (batch, hidden_size)

    # Reference check (same bf16-weight / f32-accumulate / bf16-carry math).
    # Tolerances account for bf16 carry rounding differences only.
    ref_out, ref_h = ref_sequence(x_seq, hidden0, wx, bias, wh_h, wh_o, output_size)
    assert jnp.allclose(out, ref_out, atol=2e-3, rtol=2e-3), "sequence output mismatch"
    assert jnp.allclose(h_final, ref_h, atol=1e-2, rtol=1e-2), "final hidden mismatch"

    # Single-step API parity with RNN.forward(input, hidden).
    out1, h1 = rnn_forward(x_seq[0], hidden0, wx, bias, wh_h, wh_o,
                           output_size=output_size)
    jax.block_until_ready((out1, h1))
    assert jnp.allclose(out1, ref_out[0], atol=2e-3, rtol=2e-3), "step output mismatch"

    print("KERNEL_OK")
</pallas_src>

<mosaic_0001>
module attributes {stable_mosaic.version = 11 : i64} {
  func.func @rnn_recurrence_kernel(%arg0: i32, %arg1: i32, %arg2: memref<8x8x128xf32, #tpu.memory_space<vmem>>, %arg3: memref<128x128xbf16, #tpu.memory_space<vmem>>, %arg4: memref<8x128xbf16, #tpu.memory_space<vmem>>, %arg5: memref<8x8x128xbf16, #tpu.memory_space<vmem>>, %arg6: memref<8x128xf32, #tpu.memory_space<vmem>>, %arg7: memref<8x128xbf16, #tpu.memory_space<vmem>>) attributes {dimension_semantics = [#tpu.dimension_semantics<parallel>, #tpu.dimension_semantics<arbitrary>], iteration_bounds = array<i64: 1, 2>, scalar_prefetch = 0 : i64, scratch_operands = 1 : i64, tpu.core_type = #tpu.core_type<tc>, window_params = [{transform_indices = @transform_0, window_bounds = array<i64: 8, 8, 128>}, {pipeline_mode = #tpu.pipeline_mode<synchronous>, transform_indices = @transform_1, window_bounds = array<i64: 128, 128>}, {transform_indices = @transform_2, window_bounds = array<i64: 8, 128>}, {transform_indices = @transform_3, window_bounds = array<i64: 8, 8, 128>}, {transform_indices = @transform_4, window_bounds = array<i64: 8, 128>}]} {
    %c0_i32 = arith.constant 0 : i32
    %0 = arith.cmpi eq, %arg1, %c0_i32 : i32
    %1 = arith.extui %0 : i1 to i32
    %c0_i32_0 = arith.constant 0 : i32
    %2 = arith.cmpi ne, %1, %c0_i32_0 : i32
    scf.if %2 {
      %c0_92 = arith.constant 0 : index
      %c0_93 = arith.constant 0 : index
      %110 = vector.load %arg4[%c0_92, %c0_93] : memref<8x128xbf16, #tpu.memory_space<vmem>>, vector<8x128xbf16>
      %c0_94 = arith.constant 0 : index
      %c0_95 = arith.constant 0 : index
      %111 = vector.load %arg7[%c0_94, %c0_95] : memref<8x128xbf16, #tpu.memory_space<vmem>>, vector<8x128xbf16>
      tpu.vector_store %arg7[%c0_94, %c0_95], %110 {strides = array<i32>} : memref<8x128xbf16, #tpu.memory_space<vmem>>, vector<8x128xbf16>,
    } else {
    }
    %c0_i32_1 = arith.constant 0 : i32
    %c0 = arith.constant 0 : index
    %c0_2 = arith.constant 0 : index
    %3 = vector.load %arg7[%c0, %c0_2] : memref<8x128xbf16, #tpu.memory_space<vmem>>, vector<8x128xbf16>
    %4 = arith.index_cast %c0_i32_1 : i32 to index
    %c0_3 = arith.constant 0 : index
    %c0_4 = arith.constant 0 : index
    %5 = vector.load %arg5[%4, %c0_3, %c0_4] : memref<8x8x128xbf16, #tpu.memory_space<vmem>>, vector<1x8x128xbf16>
    %6 = vector.shape_cast %5 : vector<1x8x128xbf16> to vector<8x128xbf16>
    %7 = vector.shape_cast %3 : vector<8x128xbf16> to vector<1x8x128xbf16>
    tpu.vector_store %arg5[%4, %c0_3, %c0_4], %7 {strides = array<i32>} : memref<8x8x128xbf16, #tpu.memory_space<vmem>>, vector<1x8x128xbf16>,
    %8 = arith.index_cast %c0_i32_1 : i32 to index
    %c0_5 = arith.constant 0 : index
    %c0_6 = arith.constant 0 : index
    %9 = vector.load %arg2[%8, %c0_5, %c0_6] : memref<8x8x128xf32, #tpu.memory_space<vmem>>, vector<1x8x128xf32>
    %10 = vector.shape_cast %9 : vector<1x8x128xf32> to vector<8x128xf32>
    %c0_7 = arith.constant 0 : index
    %c0_8 = arith.constant 0 : index
    %11 = vector.load %arg3[%c0_7, %c0_8] : memref<128x128xbf16, #tpu.memory_space<vmem>>, vector<128x128xbf16>
    %cst = arith.constant dense<0.000000e+00> : vector<8x128xf32>
    %12 = tpu.matmul %3, %11, %cst {dimension_numbers = #tpu.dot_dimension_numbers<[1], [0], [0], [1], [0, 0, 1, 1], [], []>} : vector<8x128xbf16>, vector<128x128xbf16>, vector<8x128xf32> -> vector<8x128xf32>
    %13 = arith.addf %10, %12 : vector<8x128xf32>
    %14 = arith.truncf %13 : vector<8x128xf32> to vector<8x128xbf16>
    %c0_9 = arith.constant 0 : index
    %c0_10 = arith.constant 0 : index
    %15 = vector.load %arg7[%c0_9, %c0_10] : memref<8x128xbf16, #tpu.memory_space<vmem>>, vector<8x128xbf16>
    tpu.vector_store %arg7[%c0_9, %c0_10], %14 {strides = array<i32>} : memref<8x128xbf16, #tpu.memory_space<vmem>>, vector<8x128xbf16>,
    %c1_i32 = arith.constant 1 : i32
    %c0_11 = arith.constant 0 : index
    %c0_12 = arith.constant 0 : index
    %16 = vector.load %arg7[%c0_11, %c0_12] : memref<8x128xbf16, #tpu.memory_space<vmem>>, vector<8x128xbf16>
    %17 = arith.index_cast %c1_i32 : i32 to index
    %c0_13 = arith.constant 0 : index
    %c0_14 = arith.constant 0 : index
    %18 = vector.load %arg5[%17, %c0_13, %c0_14] : memref<8x8x128xbf16, #tpu.memory_space<vmem>>, vector<1x8x128xbf16>
    %19 = vector.shape_cast %18 : vector<1x8x128xbf16> to vector<8x128xbf16>
    %20 = vector.shape_cast %16 : vector<8x128xbf16> to vector<1x8x128xbf16>
    tpu.vector_store %arg5[%17, %c0_13, %c0_14], %20 {strides = array<i32>} : memref<8x8x128xbf16, #tpu.memory_space<vmem>>, vector<1x8x128xbf16>,
    %21 = arith.index_cast %c1_i32 : i32 to index
    %c0_15 = arith.constant 0 : index
    %c0_16 = arith.constant 0 : index
    %22 = vector.load %arg2[%21, %c0_15, %c0_16] : memref<8x8x128xf32, #tpu.memory_space<vmem>>, vector<1x8x128xf32>
    %23 = vector.shape_cast %22 : vector<1x8x128xf32> to vector<8x128xf32>
    %c0_17 = arith.constant 0 : index
    %c0_18 = arith.constant 0 : index
    %24 = vector.load %arg3[%c0_17, %c0_18] : memref<128x128xbf16, #tpu.memory_space<vmem>>, vector<128x128xbf16>
    %cst_19 = arith.constant dense<0.000000e+00> : vector<8x128xf32>
    %25 = tpu.matmul %16, %24, %cst_19 {dimension_numbers = #tpu.dot_dimension_numbers<[1], [0], [0], [1], [0, 0, 1, 1], [], []>} : vector<8x128xbf16>, vector<128x128xbf16>, vector<8x128xf32> -> vector<8x128xf32>
    %26 = arith.addf %23, %25 : vector<8x128xf32>
    %27 = arith.truncf %26 : vector<8x128xf32> to vector<8x128xbf16>
    %c0_20 = arith.constant 0 : index
    %c0_21 = arith.constant 0 : index
    %28 = vector.load %arg7[%c0_20, %c0_21] : memref<8x128xbf16, #tpu.memory_space<vmem>>, vector<8x128xbf16>
    tpu.vector_store %arg7[%c0_20, %c0_21], %27 {strides = array<i32>} : memref<8x128xbf16, #tpu.memory_space<vmem>>, vector<8x128xbf16>,
    %c2_i32 = arith.constant 2 : i32
    %c0_22 = arith.constant 0 : index
    %c0_23 = arith.constant 0 : index
    %29 = vector.load %arg7[%c0_22, %c0_23] : memref<8x128xbf16, #tpu.memory_space<vmem>>, vector<8x128xbf16>
    %30 = arith.index_cast %c2_i32 : i32 to index
    %c0_24 = arith.constant 0 : index
    %c0_25 = arith.constant 0 : index
    %31 = vector.load %arg5[%30, %c0_24, %c0_25] : memref<8x8x128xbf16, #tpu.memory_space<vmem>>, vector<1x8x128xbf16>
    %32 = vector.shape_cast %31 : vector<1x8x128xbf16> to vector<8x128xbf16>
    %33 = vector.shape_cast %29 : vector<8x128xbf16> to vector<1x8x128xbf16>
    tpu.vector_store %arg5[%30, %c0_24, %c0_25], %33 {strides = array<i32>} : memref<8x8x128xbf16, #tpu.memory_space<vmem>>, vector<1x8x128xbf16>,
    %34 = arith.index_cast %c2_i32 : i32 to index
    %c0_26 = arith.constant 0 : index
    %c0_27 = arith.constant 0 : index
    %35 = vector.load %arg2[%34, %c0_26, %c0_27] : memref<8x8x128xf32, #tpu.memory_space<vmem>>, vector<1x8x128xf32>
    %36 = vector.shape_cast %35 : vector<1x8x128xf32> to vector<8x128xf32>
    %c0_28 = arith.constant 0 : index
    %c0_29 = arith.constant 0 : index
    %37 = vector.load %arg3[%c0_28, %c0_29] : memref<128x128xbf16, #tpu.memory_space<vmem>>, vector<128x128xbf16>
    %cst_30 = arith.constant dense<0.000000e+00> : vector<8x128xf32>
    %38 = tpu.matmul %29, %37, %cst_30 {dimension_numbers = #tpu.dot_dimension_numbers<[1], [0], [0], [1], [0, 0, 1, 1], [], []>} : vector<8x128xbf16>, vector<128x128xbf16>, vector<8x128xf32> -> vector<8x128xf32>
    %39 = arith.addf %36, %38 : vector<8x128xf32>
    %40 = arith.truncf %39 : vector<8x128xf32> to vector<8x128xbf16>
    %c0_31 = arith.constant 0 : index
    %c0_32 = arith.constant 0 : index
    %41 = vector.load %arg7[%c0_31, %c0_32] : memref<8x128xbf16, #tpu.memory_space<vmem>>, vector<8x128xbf16>
    tpu.vector_store %arg7[%c0_31, %c0_32], %40 {strides = array<i32>} : memref<8x128xbf16, #tpu.memory_space<vmem>>, vector<8x128xbf16>,
    %c3_i32 = arith.constant 3 : i32
    %c0_33 = arith.constant 0 : index
    %c0_34 = arith.constant 0 : index
    %42 = vector.load %arg7[%c0_33, %c0_34] : memref<8x128xbf16, #tpu.memory_space<vmem>>, vector<8x128xbf16>
    %43 = arith.index_cast %c3_i32 : i32 to index
    %c0_35 = arith.constant 0 : index
    %c0_36 = arith.constant 0 : index
    %44 = vector.load %arg5[%43, %c0_35, %c0_36] : memref<8x8x128xbf16, #tpu.memory_space<vmem>>, vector<1x8x128xbf16>
    %45 = vector.shape_cast %44 : vector<1x8x128xbf16> to vector<8x128xbf16>
    %46 = vector.shape_cast %42 : vector<8x128xbf16> to vector<1x8x128xbf16>
    tpu.vector_store %arg5[%43, %c0_35, %c0_36], %46 {strides = array<i32>} : memref<8x8x128xbf16, #tpu.memory_space<vmem>>, vector<1x8x128xbf16>,
    %47 = arith.index_cast %c3_i32 : i32 to index
    %c0_37 = arith.constant 0 : index
    %c0_38 = arith.constant 0 : index
    %48 = vector.load %arg2[%47, %c0_37, %c0_38] : memref<8x8x128xf32, #tpu.memory_space<vmem>>, vector<1x8x128xf32>
    %49 = vector.shape_cast %48 : vector<1x8x128xf32> to vector<8x128xf32>
    %c0_39 = arith.constant 0 : index
    %c0_40 = arith.constant 0 : index
    %50 = vector.load %arg3[%c0_39, %c0_40] : memref<128x128xbf16, #tpu.memory_space<vmem>>, vector<128x128xbf16>
    %cst_41 = arith.constant dense<0.000000e+00> : vector<8x128xf32>
    %51 = tpu.matmul %42, %50, %cst_41 {dimension_numbers = #tpu.dot_dimension_numbers<[1], [0], [0], [1], [0, 0, 1, 1], [], []>} : vector<8x128xbf16>, vector<128x128xbf16>, vector<8x128xf32> -> vector<8x128xf32>
    %52 = arith.addf %49, %51 : vector<8x128xf32>
    %53 = arith.truncf %52 : vector<8x128xf32> to vector<8x128xbf16>
    %c0_42 = arith.constant 0 : index
    %c0_43 = arith.constant 0 : index
    %54 = vector.load %arg7[%c0_42, %c0_43] : memref<8x128xbf16, #tpu.memory_space<vmem>>, vector<8x128xbf16>
    tpu.vector_store %arg7[%c0_42, %c0_43], %53 {strides = array<i32>} : memref<8x128xbf16, #tpu.memory_space<vmem>>, vector<8x128xbf16>,
    %c4_i32 = arith.constant 4 : i32
    %c0_44 = arith.constant 0 : index
    %c0_45 = arith.constant 0 : index
    %55 = vector.load %arg7[%c0_44, %c0_45] : memref<8x128xbf16, #tpu.memory_space<vmem>>, vector<8x128xbf16>
    %56 = arith.index_cast %c4_i32 : i32 to index
    %c0_46 = arith.constant 0 : index
    %c0_47 = arith.constant 0 : index
    %57 = vector.load %arg5[%56, %c0_46, %c0_47] : memref<8x8x128xbf16, #tpu.memory_space<vmem>>, vector<1x8x128xbf16>
    %58 = vector.shape_cast %57 : vector<1x8x128xbf16> to vector<8x128xbf16>
    %59 = vector.shape_cast %55 : vector<8x128xbf16> to vector<1x8x128xbf16>
    tpu.vector_store %arg5[%56, %c0_46, %c0_47], %59 {strides = array<i32>} : memref<8x8x128xbf16, #tpu.memory_space<vmem>>, vector<1x8x128xbf16>,
    %60 = arith.index_cast %c4_i32 : i32 to index
    %c0_48 = arith.constant 0 : index
    %c0_49 = arith.constant 0 : index
    %61 = vector.load %arg2[%60, %c0_48, %c0_49] : memref<8x8x128xf32, #tpu.memory_space<vmem>>, vector<1x8x128xf32>
    %62 = vector.shape_cast %61 : vector<1x8x128xf32> to vector<8x128xf32>
    %c0_50 = arith.constant 0 : index
    %c0_51 = arith.constant 0 : index
    %63 = vector.load %arg3[%c0_50, %c0_51] : memref<128x128xbf16, #tpu.memory_space<vmem>>, vector<128x128xbf16>
    %cst_52 = arith.constant dense<0.000000e+00> : vector<8x128xf32>
    %64 = tpu.matmul %55, %63, %cst_52 {dimension_numbers = #tpu.dot_dimension_numbers<[1], [0], [0], [1], [0, 0, 1, 1], [], []>} : vector<8x128xbf16>, vector<128x128xbf16>, vector<8x128xf32> -> vector<8x128xf32>
    %65 = arith.addf %62, %64 : vector<8x128xf32>
    %66 = arith.truncf %65 : vector<8x128xf32> to vector<8x128xbf16>
    %c0_53 = arith.constant 0 : index
    %c0_54 = arith.constant 0 : index
    %67 = vector.load %arg7[%c0_53, %c0_54] : memref<8x128xbf16, #tpu.memory_space<vmem>>, vector<8x128xbf16>
    tpu.vector_store %arg7[%c0_53, %c0_54], %66 {strides = array<i32>} : memref<8x128xbf16, #tpu.memory_space<vmem>>, vector<8x128xbf16>,
    %c5_i32 = arith.constant 5 : i32
    %c0_55 = arith.constant 0 : index
    %c0_56 = arith.constant 0 : index
    %68 = vector.load %arg7[%c0_55, %c0_56] : memref<8x128xbf16, #tpu.memory_space<vmem>>, vector<8x128xbf16>
    %69 = arith.index_cast %c5_i32 : i32 to index
    %c0_57 = arith.constant 0 : index
    %c0_58 = arith.constant 0 : index
    %70 = vector.load %arg5[%69, %c0_57, %c0_58] : memref<8x8x128xbf16, #tpu.memory_space<vmem>>, vector<1x8x128xbf16>
    %71 = vector.shape_cast %70 : vector<1x8x128xbf16> to vector<8x128xbf16>
    %72 = vector.shape_cast %68 : vector<8x128xbf16> to vector<1x8x128xbf16>
    tpu.vector_store %arg5[%69, %c0_57, %c0_58], %72 {strides = array<i32>} : memref<8x8x128xbf16, #tpu.memory_space<vmem>>, vector<1x8x128xbf16>,
    %73 = arith.index_cast %c5_i32 : i32 to index
    %c0_59 = arith.constant 0 : index
    %c0_60 = arith.constant 0 : index
    %74 = vector.load %arg2[%73, %c0_59, %c0_60] : memref<8x8x128xf32, #tpu.memory_space<vmem>>, vector<1x8x128xf32>
    %75 = vector.shape_cast %74 : vector<1x8x128xf32> to vector<8x128xf32>
    %c0_61 = arith.constant 0 : index
    %c0_62 = arith.constant 0 : index
    %76 = vector.load %arg3[%c0_61, %c0_62] : memref<128x128xbf16, #tpu.memory_space<vmem>>, vector<128x128xbf16>
    %cst_63 = arith.constant dense<0.000000e+00> : vector<8x128xf32>
    %77 = tpu.matmul %68, %76, %cst_63 {dimension_numbers = #tpu.dot_dimension_numbers<[1], [0], [0], [1], [0, 0, 1, 1], [], []>} : vector<8x128xbf16>, vector<128x128xbf16>, vector<8x128xf32> -> vector<8x128xf32>
    %78 = arith.addf %75, %77 : vector<8x128xf32>
    %79 = arith.truncf %78 : vector<8x128xf32> to vector<8x128xbf16>
    %c0_64 = arith.constant 0 : index
    %c0_65 = arith.constant 0 : index
    %80 = vector.load %arg7[%c0_64, %c0_65] : memref<8x128xbf16, #tpu.memory_space<vmem>>, vector<8x128xbf16>
    tpu.vector_store %arg7[%c0_64, %c0_65], %79 {strides = array<i32>} : memref<8x128xbf16, #tpu.memory_space<vmem>>, vector<8x128xbf16>,
    %c6_i32 = arith.constant 6 : i32
    %c0_66 = arith.constant 0 : index
    %c0_67 = arith.constant 0 : index
    %81 = vector.load %arg7[%c0_66, %c0_67] : memref<8x128xbf16, #tpu.memory_space<vmem>>, vector<8x128xbf16>
    %82 = arith.index_cast %c6_i32 : i32 to index
    %c0_68 = arith.constant 0 : index
    %c0_69 = arith.constant 0 : index
    %83 = vector.load %arg5[%82, %c0_68, %c0_69] : memref<8x8x128xbf16, #tpu.memory_space<vmem>>, vector<1x8x128xbf16>
    %84 = vector.shape_cast %83 : vector<1x8x128xbf16> to vector<8x128xbf16>
    %85 = vector.shape_cast %81 : vector<8x128xbf16> to vector<1x8x128xbf16>
    tpu.vector_store %arg5[%82, %c0_68, %c0_69], %85 {strides = array<i32>} : memref<8x8x128xbf16, #tpu.memory_space<vmem>>, vector<1x8x128xbf16>,
    %86 = arith.index_cast %c6_i32 : i32 to index
    %c0_70 = arith.constant 0 : index
    %c0_71 = arith.constant 0 : index
    %87 = vector.load %arg2[%86, %c0_70, %c0_71] : memref<8x8x128xf32, #tpu.memory_space<vmem>>, vector<1x8x128xf32>
    %88 = vector.shape_cast %87 : vector<1x8x128xf32> to vector<8x128xf32>
    %c0_72 = arith.constant 0 : index
    %c0_73 = arith.constant 0 : index
    %89 = vector.load %arg3[%c0_72, %c0_73] : memref<128x128xbf16, #tpu.memory_space<vmem>>, vector<128x128xbf16>
    %cst_74 = arith.constant dense<0.000000e+00> : vector<8x128xf32>
    %90 = tpu.matmul %81, %89, %cst_74 {dimension_numbers = #tpu.dot_dimension_numbers<[1], [0], [0], [1], [0, 0, 1, 1], [], []>} : vector<8x128xbf16>, vector<128x128xbf16>, vector<8x128xf32> -> vector<8x128xf32>
    %91 = arith.addf %88, %90 : vector<8x128xf32>
    %92 = arith.truncf %91 : vector<8x128xf32> to vector<8x128xbf16>
    %c0_75 = arith.constant 0 : index
    %c0_76 = arith.constant 0 : index
    %93 = vector.load %arg7[%c0_75, %c0_76] : memref<8x128xbf16, #tpu.memory_space<vmem>>, vector<8x128xbf16>
    tpu.vector_store %arg7[%c0_75, %c0_76], %92 {strides = array<i32>} : memref<8x128xbf16, #tpu.memory_space<vmem>>, vector<8x128xbf16>,
    %c7_i32 = arith.constant 7 : i32
    %c0_77 = arith.constant 0 : index
    %c0_78 = arith.constant 0 : index
    %94 = vector.load %arg7[%c0_77, %c0_78] : memref<8x128xbf16, #tpu.memory_space<vmem>>, vector<8x128xbf16>
    %95 = arith.index_cast %c7_i32 : i32 to index
    %c0_79 = arith.constant 0 : index
    %c0_80 = arith.constant 0 : index
    %96 = vector.load %arg5[%95, %c0_79, %c0_80] : memref<8x8x128xbf16, #tpu.memory_space<vmem>>, vector<1x8x128xbf16>
    %97 = vector.shape_cast %96 : vector<1x8x128xbf16> to vector<8x128xbf16>
    %98 = vector.shape_cast %94 : vector<8x128xbf16> to vector<1x8x128xbf16>
    tpu.vector_store %arg5[%95, %c0_79, %c0_80], %98 {strides = array<i32>} : memref<8x8x128xbf16, #tpu.memory_space<vmem>>, vector<1x8x128xbf16>,
    %99 = arith.index_cast %c7_i32 : i32 to index
    %c0_81 = arith.constant 0 : index
    %c0_82 = arith.constant 0 : index
    %100 = vector.load %arg2[%99, %c0_81, %c0_82] : memref<8x8x128xf32, #tpu.memory_space<vmem>>, vector<1x8x128xf32>
    %101 = vector.shape_cast %100 : vector<1x8x128xf32> to vector<8x128xf32>
    %c0_83 = arith.constant 0 : index
    %c0_84 = arith.constant 0 : index
    %102 = vector.load %arg3[%c0_83, %c0_84] : memref<128x128xbf16, #tpu.memory_space<vmem>>, vector<128x128xbf16>
    %cst_85 = arith.constant dense<0.000000e+00> : vector<8x128xf32>
    %103 = tpu.matmul %94, %102, %cst_85 {dimension_numbers = #tpu.dot_dimension_numbers<[1], [0], [0], [1], [0, 0, 1, 1], [], []>} : vector<8x128xbf16>, vector<128x128xbf16>, vector<8x128xf32> -> vector<8x128xf32>
    %104 = arith.addf %101, %103 : vector<8x128xf32>
    %105 = arith.truncf %104 : vector<8x128xf32> to vector<8x128xbf16>
    %c0_86 = arith.constant 0 : index
    %c0_87 = arith.constant 0 : index
    %106 = vector.load %arg7[%c0_86, %c0_87] : memref<8x128xbf16, #tpu.memory_space<vmem>>, vector<8x128xbf16>
    tpu.vector_store %arg7[%c0_86, %c0_87], %105 {strides = array<i32>} : memref<8x128xbf16, #tpu.memory_space<vmem>>, vector<8x128xbf16>,
    %c8_i32 = arith.constant 8 : i32
    %c0_88 = arith.constant 0 : index
    %c0_89 = arith.constant 0 : index
    %107 = vector.load %arg7[%c0_88, %c0_89] : memref<8x128xbf16, #tpu.memory_space<vmem>>, vector<8x128xbf16>
    %108 = arith.extf %107 : vector<8x128xbf16> to vector<8x128xf32>
    %c0_90 = arith.constant 0 : index
    %c0_91 = arith.constant 0 : index
    %109 = vector.load %arg6[%c0_90, %c0_91] : memref<8x128xf32, #tpu.memory_space<vmem>>, vector<8x128xf32>
    tpu.vector_store %arg6[%c0_90, %c0_91], %108 {strides = array<i32>} : memref<8x128xf32, #tpu.memory_space<vmem>>, vector<8x128xf32>,
    return
  }
  func.func @transform_0(%arg0: i32, %arg1: i32) -> (i32, i32, i32) {
    %c0_i32 = arith.constant 0 : i32
    %c0_i32_0 = arith.constant 0 : i32
    return %arg1, %arg0, %c0_i32 : i32, i32, i32
  }
  func.func @transform_1(%arg0: i32, %arg1: i32) -> (i32, i32) {
    %c0_i32 = arith.constant 0 : i32
    %c0_i32_0 = arith.constant 0 : i32
    %c0_i32_1 = arith.constant 0 : i32
    return %c0_i32, %c0_i32_0 : i32, i32
  }
  func.func @transform_2(%arg0: i32, %arg1: i32) -> (i32, i32) {
    %c0_i32 = arith.constant 0 : i32
    %c0_i32_0 = arith.constant 0 : i32
    return %arg0, %c0_i32 : i32, i32
  }
  func.func @transform_3(%arg0: i32, %arg1: i32) -> (i32, i32, i32) {
    %c0_i32 = arith.constant 0 : i32
    %c0_i32_0 = arith.constant 0 : i32
    return %arg1, %arg0, %c0_i32 : i32, i32, i32
  }
  func.func @transform_4(%arg0: i32, %arg1: i32) -> (i32, i32) {
    %c0_i32 = arith.constant 0 : i32
    %c0_i32_0 = arith.constant 0 : i32
    return %arg0, %c0_i32 : i32, i32
  }
}

module attributes {stable_mosaic.version = 11 : i64} {
  func.func @rnn_output_kernel(%arg0: i32, %arg1: memref<128x128xf32, #tpu.memory_space<vmem>>, %arg2: memref<128x128xbf16, #tpu.memory_space<vmem>>, %arg3: memref<128x128xbf16, #tpu.memory_space<vmem>>, %arg4: memref<128x128xf32, #tpu.memory_space<vmem>>) attributes {dimension_semantics = [#tpu.dimension_semantics<parallel>], iteration_bounds = array<i64: 1>, scalar_prefetch = 0 : i64, scratch_operands = 0 : i64, tpu.core_type = #tpu.core_type<tc>, window_params = [{transform_indices = @transform_0, window_bounds = array<i64: 128, 128>}, {transform_indices = @transform_1, window_bounds = array<i64: 128, 128>}, {pipeline_mode = #tpu.pipeline_mode<synchronous>, transform_indices = @transform_2, window_bounds = array<i64: 128, 128>}, {transform_indices = @transform_3, window_bounds = array<i64: 128, 128>}]} {
    %c0 = arith.constant 0 : index
    %c0_0 = arith.constant 0 : index
    %0 = vector.load %arg1[%c0, %c0_0] : memref<128x128xf32, #tpu.memory_space<vmem>>, vector<128x128xf32>
    %c0_1 = arith.constant 0 : index
    %c0_2 = arith.constant 0 : index
    %1 = vector.load %arg2[%c0_1, %c0_2] : memref<128x128xbf16, #tpu.memory_space<vmem>>, vector<128x128xbf16>
    %c0_3 = arith.constant 0 : index
    %c0_4 = arith.constant 0 : index
    %2 = vector.load %arg3[%c0_3, %c0_4] : memref<128x128xbf16, #tpu.memory_space<vmem>>, vector<128x128xbf16>
    %cst = arith.constant dense<0.000000e+00> : vector<128x128xf32>
    %3 = tpu.matmul %1, %2, %cst {dimension_numbers = #tpu.dot_dimension_numbers<[1], [0], [0], [1], [0, 0, 1, 1], [], []>} : vector<128x128xbf16>, vector<128x128xbf16>, vector<128x128xf32> -> vector<128x128xf32>
    %4 = arith.addf %0, %3 : vector<128x128xf32>
    %cst_5 = arith.constant dense<0xFF800000> : vector<128xf32>
    %5 = vector.multi_reduction <maximumf>, %4, %cst_5 [1] : vector<128x128xf32> to vector<128xf32>
    %6 = vector.shape_cast %5 : vector<128xf32> to vector<128x1xf32>
    %7 = vector.broadcast %6 : vector<128x1xf32> to vector<128x128xf32>
    %8 = arith.subf %4, %7 : vector<128x128xf32>
    %9 = math.exp %8 : vector<128x128xf32>
    %cst_6 = arith.constant dense<0.000000e+00> : vector<128xf32>
    %10 = vector.multi_reduction <add>, %9, %cst_6 [1] : vector<128x128xf32> to vector<128xf32>
    %11 = vector.shape_cast %10 : vector<128xf32> to vector<128x1xf32>
    %12 = math.log %11 : vector<128x1xf32>
    %13 = vector.broadcast %12 : vector<128x1xf32> to vector<128x128xf32>
    %14 = arith.subf %8, %13 : vector<128x128xf32>
    %c0_7 = arith.constant 0 : index
    %c0_8 = arith.constant 0 : index
    %15 = vector.load %arg4[%c0_7, %c0_8] : memref<128x128xf32, #tpu.memory_space<vmem>>, vector<128x128xf32>
    tpu.vector_store %arg4[%c0_7, %c0_8], %14 {strides = array<i32>} : memref<128x128xf32, #tpu.memory_space<vmem>>, vector<128x128xf32>,
    return
  }
  func.func @transform_0(%arg0: i32) -> (i32, i32) {
    %c0_i32 = arith.constant 0 : i32
    %c0_i32_0 = arith.constant 0 : i32
    return %arg0, %c0_i32 : i32, i32
  }
  func.func @transform_1(%arg0: i32) -> (i32, i32) {
    %c0_i32 = arith.constant 0 : i32
    %c0_i32_0 = arith.constant 0 : i32
    return %arg0, %c0_i32 : i32, i32
  }
  func.func @transform_2(%arg0: i32) -> (i32, i32) {
    %c0_i32 = arith.constant 0 : i32
    %c0_i32_0 = arith.constant 0 : i32
    %c0_i32_1 = arith.constant 0 : i32
    return %c0_i32, %c0_i32_0 : i32, i32
  }
  func.func @transform_3(%arg0: i32) -> (i32, i32) {
    %c0_i32 = arith.constant 0 : i32
    %c0_i32_0 = arith.constant 0 : i32
    return %arg0, %c0_i32 : i32, i32
  }
}

</mosaic_0001>

<bundles_post_ra>
// kernel: rnn_forward_sequence.3
= control target key start
LH: loop header
LB: loop body
LE: loop exit
PB: predicated region body
PF: predicated region fallthrough
CT: control target
= control target key end

     0   :  { %s852_s0 = inlined_call_operand.vmem [shape: f32[128,128], index: 0, kind: input, shape index: {}]   ;;  %s853_s1 = inlined_call_operand.vmem [shape: bf16[128,128], index: 1, kind: input, shape index: {}]   ;;  %s854_s2 = inlined_call_operand.vmem [shape: bf16[128,128], index: 2, kind: input, shape index: {}]   ;;  %s855_s3 = inlined_call_operand.hbm [shape: f32[128,128], index: 3, kind: output, shape index: {}]  }
   0x1   :  { %v548_v0 = vld [vmem:[%s854_s2 + $0x38] sm:$0xff]   ;;  %v549_v1 = vld [vmem:[%s854_s2 + $0x30] sm:$0xff]   ;;  %v550_v2 = vld [vmem:[%s854_s2 + $0x28] sm:$0xff]  }
   0x2   :  { %497 = vmatprep.subr.bf16.mxu0 %v548_v0  ;;  %529 = vmatprep.subr.bf16.mxu1 %v548_v0  ;;  %v551_v3 = vld [vmem:[%s854_s2 + $0x20] sm:$0xff]   ;;  %v552_v6 = vld [vmem:[%s854_s2 + $0x18] sm:$0xff]   ;;  %v553_v7 = vld [vmem:[%s854_s2 + $0x10] sm:$0xff]  }
   0x3   :  { %498 = vmatpush3.bf16.msra.mxu0 %v548_v0  ;;  %537 = vmatpush3.bf16.msra.mxu1 %v548_v0  ;;  %v556_v4 = vld [vmem:[%s853_s1] sm:$0xff]  }
   0x4   :  { %499 = vmatprep.subr.bf16.mxu0 %v549_v1  ;;  %530 = vmatprep.subr.bf16.mxu1 %v549_v1  ;;  %v557_v5 = vld [vmem:[%s853_s1 + $0x20] sm:$0xff]  }
   0x5   :  { %513 = vmatprep.mubr.bf16.mxu0 %v556_v4  ;;  %521 = vmatprep.mubr.bf16.mxu1 %v557_v5 }
   0x7   :  { %500 = vmatpush3.bf16.msra.mxu0 %v549_v1  ;;  %538 = vmatpush3.bf16.msra.mxu1 %v549_v1 }
   0x8   :  { %501 = vmatprep.subr.bf16.mxu0 %v550_v2  ;;  %531 = vmatprep.subr.bf16.mxu1 %v550_v2 }
   0xb   :  { %502 = vmatpush3.bf16.msra.mxu0 %v550_v2  ;;  %539 = vmatpush3.bf16.msra.mxu1 %v550_v2 }
   0xc   :  { %503 = vmatprep.subr.bf16.mxu0 %v551_v3  ;;  %532 = vmatprep.subr.bf16.mxu1 %v551_v3 }
   0xf   :  { %504 = vmatpush3.bf16.msra.mxu0 %v551_v3  ;;  %540 = vmatpush3.bf16.msra.mxu1 %v551_v3 }
  0x10   :  { %505 = vmatprep.subr.bf16.mxu0 %v552_v6  ;;  %533 = vmatprep.subr.bf16.mxu1 %v552_v6 }
  0x11   :  { %8 = vsyncpa [#allocation3], 0  ;;  %v554_v8 = vld [vmem:[%s854_s2 + $0x8] sm:$0xff]   ;;  %v555_v9 = vld [vmem:[%s854_s2] sm:$0xff]  }
  0x12   :  { %v558_v10 = vld [vmem:[%s853_s1 + $0x8] sm:$0xff]   ;;  %v560_v12 = vld [vmem:[%s853_s1 + $0x10] sm:$0xff]   ;;  %v561_v14 = vld [vmem:[%s853_s1 + $0x18] sm:$0xff]  }
  0x13   :  { %506 = vmatpush3.bf16.msra.mxu0 %v552_v6  ;;  %541 = vmatpush3.bf16.msra.mxu1 %v552_v6  ;;  %v559_v11 = vld [vmem:[%s853_s1 + $0x28] sm:$0xff]   ;;  %v562_v13 = vld [vmem:[%s853_s1 + $0x30] sm:$0xff]   ;;  %v563_v15 = vld [vmem:[%s853_s1 + $0x38] sm:$0xff]  }
  0x14   :  { %507 = vmatprep.subr.bf16.mxu0 %v553_v7  ;;  %534 = vmatprep.subr.bf16.mxu1 %v553_v7  ;;  %v18_v16 = vld [vmem:[%s852_s0 + $0x10] sm:$0xff]  ;;  %v16_v22 = vld [vmem:[%s852_s0] sm:$0xff]  ;;  %v19_v25 = vld [vmem:[%s852_s0 + $0x18] sm:$0xff] }
  0x15   :  { %v26_v17 = vld [vmem:[%s852_s0 + $0x50] sm:$0xff]  ;;  %v24_v30 = vld [vmem:[%s852_s0 + $0x40] sm:$0xff]  ;;  %v27_v31 = vld [vmem:[%s852_s0 + $0x58] sm:$0xff] }
  0x16   :  { %v17_v37 = vld [vmem:[%s852_s0 + $0x8] sm:$0xff]  ;;  %v22_v41 = vld [vmem:[%s852_s0 + $0x30] sm:$0xff]  ;;  %v23_v42 = vld [vmem:[%s852_s0 + $0x38] sm:$0xff] }
  0x17   :  { %508 = vmatpush3.bf16.msra.mxu0 %v553_v7  ;;  %542 = vmatpush3.bf16.msra.mxu1 %v553_v7  ;;  %v25_v38 = vld [vmem:[%s852_s0 + $0x48] sm:$0xff]  ;;  %v20_v49 = vld [vmem:[%s852_s0 + $0x20] sm:$0xff]  ;;  %v30_v60 = vld [vmem:[%s852_s0 + $0x70] sm:$0xff] }
  0x18   :  { %509 = vmatprep.subr.bf16.mxu0 %v554_v8  ;;  %535 = vmatprep.subr.bf16.mxu1 %v554_v8  ;;  %v21_v50 = vld [vmem:[%s852_s0 + $0x28] sm:$0xff]  ;;  %v28_v55 = vld [vmem:[%s852_s0 + $0x60] sm:$0xff]  ;;  %v31_v61 = vld [vmem:[%s852_s0 + $0x78] sm:$0xff] }
  0x19   :  { %v29_v56 = vld [vmem:[%s852_s0 + $0x68] sm:$0xff]  ;;  %s650_s0 = smov [#allocation2]  }
  0x1a   :  { %s454_s19 = sshll.u32 %s650_s0, 4  ;;  %s455_s19 = int_to_ptr.vmem [resolvable:$true] %s454_s19 }
  0x1b   :  { %510 = vmatpush3.bf16.msra.mxu0 %v554_v8  ;;  %543 = vmatpush3.bf16.msra.mxu1 %v554_v8  ;;  %s628_s20 = scalar_lea.vmem %s455_s19, 2048  ;;  %p633_p1 = scmp.lt.s32.totalorder %s455_s19, %s455_s19 }
  0x1c   :  { %511 = vmatprep.subr.bf16.mxu0 %v555_v9  ;;  %536 = vmatprep.subr.bf16.mxu1 %v555_v9  ;;  %p629_p0 = scmp.ne.s32.totalorder %s455_s19, %s628_s20  ;;  %p634_p2 = scmp.lt.s32.totalorder %s628_s20, %s628_s20 }
  0x1e   :  { %p635_p3 = por %p634_p2, %p633_p1 }
  0x1f   :  { %512 = vmatpush3.bf16.msra.mxu0 %v555_v9  ;;  %544 = vmatpush3.bf16.msra.mxu1 %v555_v9 }
  0x20   :  { %p636_p4 = pnand %p635_p3, %p629_p0 }
  0x22   :  { %514 = vmatmul.mubr.bf16.vlgmr.msra.gmra.mxu0 %v558_v10  ;;  %522 = vmatmul.mubr.bf16.vlgmr.msra.gmra.mxu1 %v559_v11 }
  0x23   :  { %517 = vmatprep.mubr.bf16.mxu0 %v560_v12  ;;  %525 = vmatprep.mubr.bf16.mxu1 %v562_v13 }
  0x2a   :  { %518 = vmatmul.mubr.bf16.gmra.mxu0 %v561_v14  ;;  %526 = vmatmul.mubr.bf16.gmra.mxu1 %v563_v15 }
  0xe2   :  { %v515_v18 = vpop.f32.mrf.mxu0  ;;  %v523_v19 = vpop.f32.mrf.mxu1 }
  0xe3   :  { %v259_v20 = vadd.f32 %v515_v18, %v18_v16  ;;  %v267_v21 = vadd.f32 %v523_v19, %v26_v17 }
  0xe4   :  { %v194_v23 = vpop.f32.mrf.mxu0  ;;  %v226_v24 = vpop.f32.mrf.mxu1 }
  0xe5   :  { %293 = vmax.xlane.f32.xlu0 %v267_v21  ;;  %277 = vmax.xlane.f32.xlu1 %v259_v20  ;;  %v257_v28 = vadd.f32 %v194_v23, %v16_v22  ;;  %v265_v35 = vadd.f32 %v226_v24, %v24_v30 }
  0xe6   :  { %v516_v26 = vpop.f32.mrf.mxu0  ;;  %v524_v27 = vpop.f32.mrf.mxu1 }
  0xe7   :  { %v260_v29 = vadd.f32 %v516_v26, %v19_v25  ;;  %v268_v36 = vadd.f32 %v524_v27, %v27_v31 }
  0xe8   :  { %v197_v32 = vpop.f32.mrf.mxu0  ;;  %v229_v33 = vpop.f32.mrf.mxu1 }
  0xe9   :  { %279 = vmax.xlane.f32.xlu1 %v260_v29  ;;  %273 = vmax.xlane.f32.xlu0 %v257_v28  ;;  %v258_v43 = vadd.f32 %v197_v32, %v17_v37  ;;  %v266_v44 = vadd.f32 %v229_v33, %v25_v38 }
  0xea   :  { %v519_v34 = vpop.f32.mrf.mxu0  ;;  %v527_v40 = vpop.f32.mrf.mxu1 }
  0xeb   :  { %v263_v47 = vadd.f32 %v519_v34, %v22_v41  ;;  %v775_v62 = vadd.f32 %v527_v40, %v30_v60 }
  0xec   :  { %v210_v39 = vpop.f32.mrf.mxu0  ;;  %v242_v46 = vpop.f32.mrf.mxu1 }
  0xed   :  { %295 = vmax.xlane.f32.xlu1 %v268_v36  ;;  %289 = vmax.xlane.f32.xlu0 %v265_v35  ;;  %v261_v53 = vadd.f32 %v210_v39, %v20_v49  ;;  %v763_v58 = vadd.f32 %v242_v46, %v28_v55 }
  0xee   :  { %v520_v45 = vpop.f32.mrf.mxu0  ;;  %v528_v52 = vpop.f32.mrf.mxu1 }
  0xef   :  { %v264_v48 = vadd.f32 %v520_v45, %v23_v42  ;;  %v777_v63 = vadd.f32 %v528_v52, %v31_v61 }
  0xf0   :  { %v213_v51 = vpop.f32.mrf.mxu0  ;;  %v245_v57 = vpop.f32.mrf.mxu1 }
  0xf1   :  { %291 = vmax.xlane.f32.xlu1 %v266_v44  ;;  %275 = vmax.xlane.f32.xlu0 %v258_v43  ;;  %v262_v54 = vadd.f32 %v213_v51, %v21_v50  ;;  %v765_v59 = vadd.f32 %v245_v57, %v29_v56 }
  0xf5   :  { %287 = vmax.xlane.f32.xlu1 %v264_v48  ;;  %285 = vmax.xlane.f32.xlu0 %v263_v47 }
  0xf9   :  { %283 = vmax.xlane.f32.xlu1 %v262_v54  ;;  %281 = vmax.xlane.f32.xlu0 %v261_v53 }
  0xfd   :  { %299 = vmax.xlane.f32.xlu1 %v765_v59  ;;  %297 = vmax.xlane.f32.xlu0 %v763_v58 }
 0x101   :  { %303 = vmax.xlane.f32.xlu1 %v777_v63  ;;  %301 = vmax.xlane.f32.xlu0 %v775_v62 }
 0x16e   :  { %v294_v0 = vpop.xlane.xlu0 %293  ;;  %v278_v1 = vpop.xlane.xlu1 %277 }
 0x16f   :  { %v781_v2 = vsub.f32 %v259_v20, %v278_v1  ;;  %v783_v3 = vsub.f32 %v267_v21, %v294_v0 }
 0x171   :  { %v325_v4 = vmul.f32 1.442695, %v781_v2  ;;  %v341_v8 = vmul.f32 1.442695, %v783_v3 }
 0x172   :  { %v280_v5 = vpop.xlane.xlu1 %279  ;;  %v274_v6 = vpop.xlane.xlu0 %273 }
 0x173   :  { %v786_v7 = vsub.f32 %v260_v29, %v280_v5  ;;  %564 = vpow2.f32 %v325_v4  ;;  %v789_v9 = vsub.f32 %v257_v28, %v274_v6 }
 0x175   :  { %v327_v10 = vmul.f32 1.442695, %v786_v7  ;;  %v321_v15 = vmul.f32 1.442695, %v789_v9 }
 0x176   :  { %v296_v11 = vpop.xlane.xlu1 %295  ;;  %v290_v12 = vpop.xlane.xlu0 %289 }
 0x177   :  { %566 = vpow2.f32 %v327_v10  ;;  %v792_v13 = vsub.f32 %v268_v36, %v296_v11  ;;  %v794_v14 = vsub.f32 %v265_v35, %v290_v12 }
 0x178   :  { %568 = vpow2.f32 %v341_v8 }
 0x179   :  { %v343_v16 = vmul.f32 1.442695, %v792_v13  ;;  %v337_v19 = vmul.f32 1.442695, %v794_v14 }
 0x17a   :  { %v292_v17 = vpop.xlane.xlu1 %291  ;;  %v276_v18 = vpop.xlane.xlu0 %275 }
 0x17b   :  { %570 = vpow2.f32 %v343_v16  ;;  %v799_v20 = vsub.f32 %v266_v44, %v292_v17  ;;  %v801_v21 = vsub.f32 %v258_v43, %v276_v18 }
 0x17c   :  { %572 = vpow2.f32 %v321_v15 }
 0x17d   :  { %v323_v22 = vmul.f32 1.442695, %v801_v21  ;;  %574 = vpow2.f32 %v337_v19  ;;  %v339_v25 = vmul.f32 1.442695, %v799_v20 }
 0x17e   :  { %v288_v23 = vpop.xlane.xlu1 %287  ;;  %v286_v24 = vpop.xlane.xlu0 %285 }
 0x17f   :  { %v805_v26 = vsub.f32 %v264_v48, %v288_v23  ;;  %v807_v27 = vsub.f32 %v263_v47, %v286_v24  ;;  %576 = vpow2.f32 %v323_v22 }
 0x180   :  { %v565_v28 = vpop.eup %564  ;;  %578 = vpow2.f32 %v339_v25 }
 0x181   :  { %v333_v29 = vmul.f32 1.442695, %v807_v27  ;;  %357 = vadd.xlane.f32.xlu0 %v565_v28  ;;  %v335_v32 = vmul.f32 1.442695, %v805_v26 }
 0x182   :  { %v284_v30 = vpop.xlane.xlu1 %283  ;;  %v282_v31 = vpop.xlane.xlu0 %281 }
 0x183   :  { %v811_v33 = vsub.f32 %v262_v54, %v284_v30  ;;  %v813_v34 = vsub.f32 %v261_v53, %v282_v31  ;;  %580 = vpow2.f32 %v333_v29 }
 0x184   :  { %v567_v35 = vpop.eup %566  ;;  %582 = vpow2.f32 %v335_v32 }
 0x185   :  { %v569_v36 = vpop.eup %568  ;;  %v329_v37 = vmul.f32 1.442695, %v813_v34  ;;  %359 = vadd.xlane.f32.xlu1 %v567_v35  ;;  %v331_v40 = vmul.f32 1.442695, %v811_v33 }
 0x186   :  { %373 = vadd.xlane.f32.xlu0 %v569_v36  ;;  %v300_v38 = vpop.xlane.xlu1 %299  ;;  %v298_v39 = vpop.xlane.xlu0 %297 }
 0x187   :  { %v818_v41 = vsub.f32 %v765_v59, %v300_v38  ;;  %v821_v42 = vsub.f32 %v763_v58, %v298_v39  ;;  %584 = vpow2.f32 %v329_v37 }
 0x188   :  { %v571_v43 = vpop.eup %570  ;;  %586 = vpow2.f32 %v331_v40 }
 0x189   :  { %v573_v44 = vpop.eup %572  ;;  %v345_v45 = vmul.f32 1.442695, %v821_v42  ;;  %375 = vadd.xlane.f32.xlu1 %v571_v43  ;;  %v347_v48 = vmul.f32 1.442695, %v818_v41 }
 0x18a   :  { %353 = vadd.xlane.f32.xlu0 %v573_v44  ;;  %v304_v46 = vpop.xlane.xlu1 %303  ;;  %v302_v47 = vpop.xlane.xlu0 %301 }
 0x18b   :  { %v826_v49 = vsub.f32 %v775_v62, %v302_v47  ;;  %v575_v50 = vpop.eup %574  ;;  %588 = vpow2.f32 %v345_v45  ;;  %v829_v51 = vsub.f32 %v777_v63, %v304_v46 }
 0x18c   :  { %v577_v52 = vpop.eup %576  ;;  %590 = vpow2.f32 %v347_v48 }
 0x18d   :  { %v349_v53 = vmul.f32 1.442695, %v826_v49  ;;  %355 = vadd.xlane.f32.xlu1 %v577_v52  ;;  %v579_v54 = vpop.eup %578  ;;  %v351_v55 = vmul.f32 1.442695, %v829_v51 }
 0x18e   :  { %369 = vadd.xlane.f32.xlu0 %v575_v50 }
 0x18f   :  { %592 = vpow2.f32 %v349_v53 }
 0x190   :  { %v581_v56 = vpop.eup %580  ;;  %594 = vpow2.f32 %v351_v55 }
 0x191   :  { %371 = vadd.xlane.f32.xlu1 %v579_v54  ;;  %v583_v57 = vpop.eup %582 }
 0x192   :  { %365 = vadd.xlane.f32.xlu0 %v581_v56 }
 0x194   :  { %v585_v58 = vpop.eup %584 }
 0x195   :  { %367 = vadd.xlane.f32.xlu1 %v583_v57  ;;  %v587_v59 = vpop.eup %586 }
 0x196   :  { %361 = vadd.xlane.f32.xlu0 %v585_v58 }
 0x198   :  { %v589_v60 = vpop.eup %588 }
 0x199   :  { %363 = vadd.xlane.f32.xlu1 %v587_v59  ;;  %v591_v61 = vpop.eup %590 }
 0x19a   :  { %377 = vadd.xlane.f32.xlu0 %v589_v60 }
 0x19c   :  { %v593_v62 = vpop.eup %592 }
 0x19d   :  { %379 = vadd.xlane.f32.xlu1 %v591_v61  ;;  %v595_v63 = vpop.eup %594 }
 0x19e   :  { %381 = vadd.xlane.f32.xlu0 %v593_v62 }
 0x1a1   :  { %383 = vadd.xlane.f32.xlu1 %v595_v63 }
 0x20a   :  { %v358_v0 = vpop.xlane.xlu0 %357 }
 0x20b   :  { %596 = vlog2.f32 %v358_v0 }
 0x20e   :  { %v360_v1 = vpop.xlane.xlu1 %359 }
 0x20f   :  { %598 = vlog2.f32 %v360_v1  ;;  %v374_v4 = vpop.xlane.xlu0 %373 }
 0x210   :  { %600 = vlog2.f32 %v374_v4 }
 0x212   :  { %v376_v5 = vpop.xlane.xlu1 %375 }
 0x213   :  { %602 = vlog2.f32 %v376_v5  ;;  %v354_v6 = vpop.xlane.xlu0 %353 }
 0x214   :  { %604 = vlog2.f32 %v354_v6 }
 0x216   :  { %v356_v8 = vpop.xlane.xlu1 %355 }
 0x217   :  { %v370_v10 = vpop.xlane.xlu0 %369  ;;  %606 = vlog2.f32 %v356_v8 }
 0x218   :  { %v597_v11 = vpop.eup %596  ;;  %608 = vlog2.f32 %v370_v10 }
 0x219   :  { %v390_v12 = vmul.f32 0.6931472, %v597_v11 }
 0x21a   :  { %v372_v15 = vpop.xlane.xlu1 %371 }
 0x21b   :  { %v366_v16 = vpop.xlane.xlu0 %365  ;;  %v419_v18 = vsub.f32 %v781_v2, %v390_v12  ;;  %610 = vlog2.f32 %v372_v15 }
 0x21c   :  { %v599_v17 = vpop.eup %598  ;;  %612 = vlog2.f32 %v366_v16 }
 0x21d   :  { %v601_v19 = vpop.eup %600  ;;  %v392_v22 = vmul.f32 0.6931472, %v599_v17  ;;  %435 = vst [vmem:[#allocation2 + $0x10] sm:$0xff] %v419_v18 }
 0x21e   :  { %v406_v23 = vmul.f32 0.6931472, %v601_v19  ;;  %v368_v25 = vpop.xlane.xlu1 %367 }
 0x21f   :  { %v420_v24 = vsub.f32 %v786_v7, %v392_v22  ;;  %v362_v28 = vpop.xlane.xlu0 %361  ;;  %614 = vlog2.f32 %v368_v25 }
 0x220   :  { %v603_v29 = vpop.eup %602  ;;  %v427_v30 = vsub.f32 %v783_v3, %v406_v23  ;;  %616 = vlog2.f32 %v362_v28 }
 0x221   :  { %v605_v31 = vpop.eup %604  ;;  %436 = vst [vmem:[#allocation2 + $0x18] sm:$0xff] %v420_v24  ;;  %v408_v32 = vmul.f32 0.6931472, %v603_v29 }
 0x222   :  { %443 = vst [vmem:[#allocation2 + $0x50] sm:$0xff] %v427_v30  ;;  %v386_v2 = vmul.f32 0.6931472, %v605_v31  ;;  %v364_v36 = vpop.xlane.xlu1 %363 }
 0x223   :  { %v428_v35 = vsub.f32 %v792_v13, %v408_v32  ;;  %v378_v37 = vpop.xlane.xlu0 %377  ;;  %618 = vlog2.f32 %v364_v36 }
 0x224   :  { %v417_v38 = vsub.f32 %v789_v9, %v386_v2  ;;  %v607_v7 = vpop.eup %606  ;;  %620 = vlog2.f32 %v378_v37 }
 0x225   :  { %444 = vst [vmem:[#allocation2 + $0x58] sm:$0xff] %v428_v35  ;;  %v609_v39 = vpop.eup %608  ;;  %v388_v3 = vmul.f32 0.6931472, %v607_v7 }
 0x226   :  { %433 = vst [vmem:[#allocation2] sm:$0xff] %v417_v38  ;;  %v402_v40 = vmul.f32 0.6931472, %v609_v39  ;;  %v380_v43 = vpop.xlane.xlu1 %379 }
 0x227   :  { %v382_v44 = vpop.xlane.xlu0 %381  ;;  %v418_v45 = vsub.f32 %v801_v21, %v388_v3  ;;  %622 = vlog2.f32 %v380_v43 }
 0x228   :  { %v611_v46 = vpop.eup %610  ;;  %v425_v13 = vsub.f32 %v794_v14, %v402_v40  ;;  %624 = vlog2.f32 %v382_v44 }
 0x229   :  { %v613_v47 = vpop.eup %612  ;;  %434 = vst [vmem:[#allocation2 + $0x8] sm:$0xff] %v418_v45  ;;  %v404_v9 = vmul.f32 0.6931472, %v611_v46 }
 0x22a   :  { %441 = vst [vmem:[#allocation2 + $0x40] sm:$0xff] %v425_v13  ;;  %v398_v48 = vmul.f32 0.6931472, %v613_v47  ;;  %v384_v50 = vpop.xlane.xlu1 %383 }
 0x22b   :  { %v426_v52 = vsub.f32 %v799_v20, %v404_v9  ;;  %626 = vlog2.f32 %v384_v50 }
 0x22c   :  { %v615_v53 = vpop.eup %614  ;;  %v423_v54 = vsub.f32 %v807_v27, %v398_v48 }
 0x22d   :  { %v617_v55 = vpop.eup %616  ;;  %442 = vst [vmem:[#allocation2 + $0x48] sm:$0xff] %v426_v52  ;;  %v400_v21 = vmul.f32 0.6931472, %v615_v53 }
 0x22e   :  { %439 = vst [vmem:[#allocation2 + $0x30] sm:$0xff] %v423_v54  ;;  %v394_v56 = vmul.f32 0.6931472, %v617_v55 }
 0x22f   :  { %v424_v14 = vsub.f32 %v805_v26, %v400_v21 }
 0x230   :  { %v619_v57 = vpop.eup %618  ;;  %v421_v58 = vsub.f32 %v813_v34, %v394_v56 }
 0x231   :  { %v621_v59 = vpop.eup %620  ;;  %440 = vst [vmem:[#allocation2 + $0x38] sm:$0xff] %v424_v14  ;;  %v396_v60 = vmul.f32 0.6931472, %v619_v57 }
 0x232   :  { %437 = vst [vmem:[#allocation2 + $0x20] sm:$0xff] %v421_v58  ;;  %v410_v61 = vmul.f32 0.6931472, %v621_v59 }
 0x233   :  { %v422_v20 = vsub.f32 %v811_v33, %v396_v60 }
 0x234   :  { %v623_v62 = vpop.eup %622  ;;  %v429_v27 = vsub.f32 %v821_v42, %v410_v61 }
 0x235   :  { %v625_v63 = vpop.eup %624  ;;  %438 = vst [vmem:[#allocation2 + $0x28] sm:$0xff] %v422_v20  ;;  %v412_v0 = vmul.f32 0.6931472, %v623_v62 }
 0x236   :  { %445 = vst [vmem:[#allocation2 + $0x60] sm:$0xff] %v429_v27  ;;  %v414_v1 = vmul.f32 0.6931472, %v625_v63 }
 0x237   :  { %v430_v26 = vsub.f32 %v818_v41, %v412_v0 }
 0x238   :  { %v627_v4 = vpop.eup %626  ;;  %v431_v34 = vsub.f32 %v826_v49, %v414_v1 }
 0x239   :  { %446 = vst [vmem:[#allocation2 + $0x68] sm:$0xff] %v430_v26  ;;  %v416_v5 = vmul.f32 0.6931472, %v627_v4 }
 0x23a   :  { %447 = vst [vmem:[#allocation2 + $0x70] sm:$0xff] %v431_v34 }
 0x23b   :  { %v432_v33 = vsub.f32 %v829_v51, %v416_v5 }
 0x23d   :  { %448 = vst [vmem:[#allocation2 + $0x78] sm:$0xff] %v432_v33 }
 0x23e   :  { %639 = shalt.err (!%p636_p4)
}
 0x23f   :  { %s651_s21 = smov 128   ;;  %s652_s1 = smov 8  }
 0x240   :  { %460 = dma.vmem_to_hbm [thread:$0]  %s455_s19, 2048, %s855_s3, [#allocation3], %s651_s21, %s651_s21, %s652_s1  }
 0x241   :  { %648 = dma.done.wait [#allocation3], 2048  }
 0x242   :  { %649 = vsyncadd [#allocation3], 4294965248 }
 0x243   :  { %464 = vsyncpa [#allocation3], 1 }

// kernel: rnn_forward_sequence.2
= control target key start
LH: loop header
LB: loop body
LE: loop exit
PB: predicated region body
PF: predicated region fallthrough
CT: control target
= control target key end

     0   :  { %10 = vsyncpa [#allocation4], 0  ;;  %s1780_s15 = smov 0   ;;  %s1782_s16 = smov 0   ;;  %s2126_s0 = inlined_call_operand.vmem [shape: f32[16,8,128], index: 0, kind: input, shape index: {}]   ;;  %s2127_s1 = inlined_call_operand.vmem [shape: bf16[128,128], index: 1, kind: input, shape index: {}]   ;;  %s2128_s2 = inlined_call_operand.vmem [shape: bf16[8,128], index: 2, kind: input, shape index: {}]   ;;  %s2129_s3 = inlined_call_operand.vmem [shape: bf16[16,8,128], index: 3, kind: output, shape index: {0}]   ;;  %s2130_s4 = inlined_call_operand.hbm [shape: f32[8,128], index: 4, kind: output, shape index: {1}]  }
   0x1   :  { %s1784_s17 = smov 0  }
   0x2 LB: > { %s1278_s18 = sadd.s32 4294967295, %s1750_s17   ;;  %s25_s19 = sadd.s32 1, %s1746_s16  ;;  %s1750_s17 = sphi %s1784_s17, %s16_s17   ;;  %s1746_s16 = sphi %s1782_s16, %s2133_s16   ;;  %s1742_s15 = sphi %s1780_s15, %s2132_s15  }
   0x3   : > { %p26_p0 = scmp.ge.s32.totalorder %s25_s19, 2  ;;  %p1283_p1 = scmp.ge.s32.totalorder %s1750_s17, 1 }
   0x4   : > { %p195_p2 = scmp.lt.s32.totalorder %s1750_s17, 3 }
   0x5   : > { %s2135_s19 = smov (%p26_p0, %s25_s19), 0 }
   0x6   : > { %p196_p3 = pnand %p1283_p1, %p195_p2 }
   0x7   : > { %s1284_s20 = sshll.u32 (!%p196_p3), %s1742_s15, 3  ;;  %p1288_p5 = scmp.ne.s32.totalorder (!%p196_p3), %s1742_s15, 0 }
   0x8   : > { %199 = sbr.rel (%p196_p3) target bundleno = 1700 (0x6a4), region = 32  ;;  %p232_p4 = scmp.lt.s32.totalorder (!%p196_p3), %s1284_s20, 15 }
   0xd   : > { %s2137_s20 = smov (!%p232_p4, %s1284_s20), 15  ;;  %257 = sbr.rel (%p1288_p5) target bundleno = 20 (0x14), region = 36 }
   0xe   : > { %s1285_s21 = sshll.u32 %s2137_s20, 3  ;;  %s1287_s22 = sshll.u32 %s2137_s20, 2 }
   0xf   : > { %s1802_s25 = scalar_lea.vmem %s2126_s0, %s1285_s21  ;;  %s1807_s28 = scalar_lea.vmem %s2129_s3, %s1287_s22 }
  0x12   : > { %v258_v0 = vld [vmem:[%s2128_s2] sm:$0xf] }
  0x13   : > { %259 = vst [vmem:[#allocation2] sm:$0xf] %v258_v0 }
  0x14 PF: > { %v1636_v1 = vld [vmem:[%s2127_s1 + $0x38] sm:$0xff]   ;;  %v1752_v2 = vmov 0.0   ;;  %v1637_v3 = vld [vmem:[%s2127_s1 + $0x30] sm:$0xff]   ;;  %vm1753_vm0 = vmmov 0   ;;  %v1638_v4 = vld [vmem:[%s2127_s1 + $0x28] sm:$0xff]   ;;  %s1754_s13 = smov [#allocation3]  }
  0x15   : > { %1443 = vmatprep.subr.bf16.mxu0 %v1752_v2  ;;  %1463 = vmatprep.subr.bf16.mxu1 %v1752_v2  ;;  %v1644_v6 = vld [vmem:[%s2127_s1 + $0x38] sm:$0xff]   ;;  %v1639_v7 = vld [vmem:[%s2127_s1 + $0x20] sm:$0xff]   ;;  %v1645_v8 = vld [vmem:[%s2127_s1 + $0x30] sm:$0xff]   ;;  %s1178_s14 = sshll.u32 %s1754_s13, 4  ;;  %p2102_p6 = scmp.eq.s32.totalorder %s1278_s18, 1  ;;  %s1179_s14 = int_to_ptr.vmem [resolvable:$true] %s1178_s14 }
  0x16   : > { %1444 = vmatpush3.bf16.msra.mxu0 %v1636_v1  ;;  %1459 = vmatprep.mubr.msk.bf16.mxu0 %vm1753_vm0, %v1752_v2  ;;  %v1640_v9 = vld [vmem:[%s2127_s1 + $0x18] sm:$0xff]   ;;  %v1646_v10 = vld [vmem:[%s2127_s1 + $0x28] sm:$0xff]   ;;  %v1641_v11 = vld [vmem:[%s2127_s1 + $0x10] sm:$0xff]   ;;  %p1707_p10 = scmp.lt.s32.totalorder %s1179_s14, %s1179_s14 }
  0x17   : > { %1445 = vmatprep.subr.bf16.mxu0 %v1752_v2  ;;  %1479 = vmatprep.mubr.msk.bf16.mxu1 %vm1753_vm0, %v1752_v2  ;;  %v1647_v12 = vld [vmem:[%s2127_s1 + $0x20] sm:$0xff]   ;;  %v1642_v13 = vld [vmem:[%s2127_s1 + $0x8] sm:$0xff]   ;;  %v1648_v14 = vld [vmem:[%s2127_s1 + $0x18] sm:$0xff]  }
  0x18   : > { %1464 = vmatpush3.bf16.msra.mxu1 %v1644_v6  ;;  %v1643_v15 = vld [vmem:[%s2127_s1] sm:$0xff]   ;;  %v1649_v16 = vld [vmem:[%s2127_s1 + $0x10] sm:$0xff]   ;;  %v1650_v17 = vld [vmem:[%s2127_s1 + $0x8] sm:$0xff]  }
  0x19   : > { %1465 = vmatprep.subr.bf16.mxu1 %v1752_v2  ;;  %v1651_v18 = vld [vmem:[%s2127_s1] sm:$0xff]   ;;  %v1652_v19 = vld [vmem:[%s2127_s1 + $0x38] sm:$0xff]   ;;  %v1653_v20 = vld [vmem:[%s2127_s1 + $0x30] sm:$0xff]  }
  0x1a   : > { %1446 = vmatpush3.bf16.msra.mxu0 %v1637_v3  ;;  %v260_v5 = vld [vmem:[#allocation2] sm:$0xf]  ;;  %v1654_v21 = vld [vmem:[%s2127_s1 + $0x28] sm:$0xff]   ;;  %v1656_v23 = vld [vmem:[%s2127_s1 + $0x18] sm:$0xff]  }
  0x1b   : > { %1447 = vmatprep.subr.bf16.mxu0 %v1752_v2  ;;  %261 = vst [vmem:[%s1807_s28] sm:$0xf] %v260_v5  ;;  %v1655_v22 = vld [vmem:[%s2127_s1 + $0x20] sm:$0xff]   ;;  %v1657_v32 = vld [vmem:[%s2127_s1 + $0x10] sm:$0xff]   ;;  %v1658_v33 = vld [vmem:[%s2127_s1 + $0x8] sm:$0xff]  }
  0x1c   : > { %1466 = vmatpush3.bf16.msra.mxu1 %v1645_v8  ;;  %v262_v24 = vld [vmem:[%s1802_s25] sm:$0xff]  ;;  %v1660_v35 = vld [vmem:[%s2127_s1 + $0x38] sm:$0xff]   ;;  %v1661_v36 = vld [vmem:[%s2127_s1 + $0x30] sm:$0xff]  }
  0x1d   : > { %1467 = vmatprep.subr.bf16.mxu1 %v1752_v2  ;;  %v1659_v34 = vld [vmem:[%s2127_s1] sm:$0xff]   ;;  %v1662_v37 = vld [vmem:[%s2127_s1 + $0x28] sm:$0xff]   ;;  %v1664_v39 = vld [vmem:[%s2127_s1 + $0x18] sm:$0xff]  }
  0x1e   : > { %1448 = vmatpush3.bf16.msra.mxu0 %v1638_v4  ;;  %v1663_v38 = vld [vmem:[%s2127_s1 + $0x20] sm:$0xff]   ;;  %v1298_v40 = vld [vmem:[%s1802_s25 + $0x8] sm:$0xff]  ;;  %v1665_v48 = vld [vmem:[%s2127_s1 + $0x10] sm:$0xff]  }
  0x1f   : > { %1449 = vmatprep.subr.bf16.mxu0 %v1752_v2  ;;  %v1666_v49 = vld [vmem:[%s2127_s1 + $0x8] sm:$0xff]   ;;  %v1667_v50 = vld [vmem:[%s2127_s1] sm:$0xff]   ;;  %v1668_v51 = vld [vmem:[%s2127_s1 + $0x38] sm:$0xff]  }
  0x20   : > { %1468 = vmatpush3.bf16.msra.mxu1 %v1646_v10  ;;  %v1669_v52 = vld [vmem:[%s2127_s1 + $0x30] sm:$0xff]   ;;  %v1670_v53 = vld [vmem:[%s2127_s1 + $0x28] sm:$0xff]   ;;  %v1671_v54 = vld [vmem:[%s2127_s1 + $0x20] sm:$0xff]  }
  0x21   : > { %1469 = vmatprep.subr.bf16.mxu1 %v1752_v2  ;;  %v1672_v55 = vld [vmem:[%s2127_s1 + $0x18] sm:$0xff]   ;;  %v1308_v56 = vld [vmem:[%s1802_s25 + $0x10] sm:$0xff]  ;;  %v1674_v1 = vld [vmem:[%s2127_s1 + $0x8] sm:$0xff]  }
  0x22   : > { %1450 = vmatpush3.bf16.msra.mxu0 %v1639_v7  ;;  %v1673_v0 = vld [vmem:[%s2127_s1 + $0x10] sm:$0xff]   ;;  %v1675_v3 = vld [vmem:[%s2127_s1] sm:$0xff]   ;;  %v1676_v4 = vld [vmem:[%s2127_s1 + $0x38] sm:$0xff]  }
  0x23   : > { %1451 = vmatprep.subr.bf16.mxu0 %v1752_v2  ;;  %v1678_v6 = vld [vmem:[%s2127_s1 + $0x28] sm:$0xff]   ;;  %v1679_v7 = vld [vmem:[%s2127_s1 + $0x20] sm:$0xff]   ;;  %v1680_v8 = vld [vmem:[%s2127_s1 + $0x18] sm:$0xff]  }
  0x24   : > { %1470 = vmatpush3.bf16.msra.mxu1 %v1647_v12 }
  0x25   : > { %1471 = vmatprep.subr.bf16.mxu1 %v1752_v2 }
  0x26   : > { %1452 = vmatpush3.bf16.msra.mxu0 %v1640_v9  ;;  %v1318_v9 = vld [vmem:[%s1802_s25 + $0x18] sm:$0xff] }
  0x27   : > { %1453 = vmatprep.subr.bf16.mxu0 %v1752_v2 }
  0x28   : > { %1472 = vmatpush3.bf16.msra.mxu1 %v1648_v14 }
  0x29   : > { %1473 = vmatprep.subr.bf16.mxu1 %v1752_v2 }
  0x2a   : > { %1454 = vmatpush3.bf16.msra.mxu0 %v1641_v11 }
  0x2b   : > { %1455 = vmatprep.subr.bf16.mxu0 %v1752_v2 }
  0x2c   : > { %1474 = vmatpush3.bf16.msra.mxu1 %v1649_v16 }
  0x2d   : > { %1475 = vmatprep.subr.bf16.mxu1 %v1752_v2 }
  0x2e   : > { %1456 = vmatpush3.bf16.msra.mxu0 %v1642_v13 }
  0x2f   : > { %1457 = vmatprep.subr.bf16.mxu0 %v1752_v2 }
  0x30   : > { %1476 = vmatpush3.bf16.msra.mxu1 %v1650_v17  ;;  %v1681_v17 = vld [vmem:[%s2127_s1 + $0x10] sm:$0xff]  }
  0x31   : > { %1477 = vmatprep.subr.bf16.mxu1 %v1752_v2 }
  0x32   : > { %1458 = vmatpush3.bf16.msra.mxu0 %v1643_v15 }
  0x33   : > { %1483 = vmatprep.subr.bf16.mxu0 %v1752_v2 }
  0x34   : > { %1478 = vmatpush3.bf16.msra.mxu1 %v1651_v18  ;;  %v1682_v18 = vld [vmem:[%s2127_s1 + $0x8] sm:$0xff]  }
  0x35   : > { %1460 = vmatmul.mubr.bf16.vlgmr.msra.gmra.mxu0 %v260_v5  ;;  %1503 = vmatprep.subr.bf16.mxu1 %v1752_v2  ;;  %v1677_v5 = vld [vmem:[%s2127_s1 + $0x30] sm:$0xff]  }
  0x36   : > { %1499 = vmatprep.mubr.msk.bf16.mxu0 %vm1753_vm0, %v1752_v2  ;;  %1484 = vmatpush3.bf16.msra.mxu0 %v1652_v19  ;;  %v1683_v19 = vld [vmem:[%s2127_s1] sm:$0xff]  }
  0x37   : > { %1485 = vmatprep.subr.bf16.mxu0 %v1752_v2 }
  0x3a   : > { %1486 = vmatpush3.bf16.msra.mxu0 %v1653_v20  ;;  %v1684_v20 = vld [vmem:[%s2127_s1 + $0x38] sm:$0xff]  }
  0x3b   : > { %1487 = vmatprep.subr.bf16.mxu0 %v1752_v2 }
  0x3e   : > { %1488 = vmatpush3.bf16.msra.mxu0 %v1654_v21  ;;  %v1685_v21 = vld [vmem:[%s2127_s1 + $0x30] sm:$0xff]  }
  0x3f   : > { %1489 = vmatprep.subr.bf16.mxu0 %v1752_v2 }
  0x42   : > { %1490 = vmatpush3.bf16.msra.mxu0 %v1655_v22  ;;  %v1686_v22 = vld [vmem:[%s2127_s1 + $0x28] sm:$0xff]  }
  0x43   : > { %1491 = vmatprep.subr.bf16.mxu0 %v1752_v2 }
  0x46   : > { %1492 = vmatpush3.bf16.msra.mxu0 %v1656_v23  ;;  %v1687_v23 = vld [vmem:[%s2127_s1 + $0x20] sm:$0xff]  }
  0x47   : > { %1493 = vmatprep.subr.bf16.mxu0 %v1752_v2 }
  0x4a   : > { %1494 = vmatpush3.bf16.msra.mxu0 %v1657_v32 }
  0x4b   : > { %1495 = vmatprep.subr.bf16.mxu0 %v1752_v2 }
  0x4e   : > { %1496 = vmatpush3.bf16.msra.mxu0 %v1658_v33  ;;  %v1689_v33 = vld [vmem:[%s2127_s1 + $0x10] sm:$0xff]  }
  0x4f   : > { %1497 = vmatprep.subr.bf16.mxu0 %v1752_v2 }
  0x52   : > { %1498 = vmatpush3.bf16.msra.mxu0 %v1659_v34  ;;  %v1690_v34 = vld [vmem:[%s2127_s1 + $0x8] sm:$0xff]  }
  0x53   : > { %1523 = vmatprep.subr.bf16.mxu0 %v1752_v2 }
  0xf5   : > { %v361_v25 = vpop.f32.mrf.mxu0 }
  0xf6   : > { %v367_v26 = vadd.f32 %v361_v25, %v262_v24  ;;  %v1688_v24 = vld [vmem:[%s2127_s1 + $0x18] sm:$0xff]   ;;  %v1328_v25 = vld [vmem:[%s1802_s25 + $0x20] sm:$0xff] }
  0xf7   : > { %v1461_v27 = vpop.f32.mrf.mxu0 }
  0xf8   : > { %v368_v28 = vpack.c.bf16 %v367_v26, %v367_v26 }
  0xf9   : > { %v364_v29 = vpop.f32.mrf.mxu0 }
  0xfa   : > { %369 = vst [vmem:[#allocation2] sm:$0xf] %v368_v28 }
  0xfb   : > { %v1462_v30 = vpop.f32.mrf.mxu0 }
 0x101   : > { %v370_v31 = vld [vmem:[#allocation2] sm:$0xf] }
 0x102   : > { %1297 = vst [vmem:[%s1807_s28 + $0x4] sm:$0xf] %v370_v31  ;;  %1480 = vmatmul.mubr.bf16.vlgmr.msra.gmra.mxu1 %v370_v31 }
 0x103   : > { %1519 = vmatprep.mubr.msk.bf16.mxu1 %vm1753_vm0, %v1752_v2  ;;  %1504 = vmatpush3.bf16.msra.mxu1 %v1660_v35  ;;  %v1691_v35 = vld [vmem:[%s2127_s1] sm:$0xff]  }
 0x104   : > { %1505 = vmatprep.subr.bf16.mxu1 %v1752_v2 }
 0x107   : > { %1506 = vmatpush3.bf16.msra.mxu1 %v1661_v36  ;;  %v1692_v36 = vld [vmem:[%s2127_s1 + $0x38] sm:$0xff]  }
 0x108   : > { %1507 = vmatprep.subr.bf16.mxu1 %v1752_v2 }
 0x10b   : > { %1508 = vmatpush3.bf16.msra.mxu1 %v1662_v37  ;;  %v1693_v37 = vld [vmem:[%s2127_s1 + $0x30] sm:$0xff]  }
 0x10c   : > { %1509 = vmatprep.subr.bf16.mxu1 %v1752_v2 }
 0x10f   : > { %1510 = vmatpush3.bf16.msra.mxu1 %v1663_v38  ;;  %v1694_v38 = vld [vmem:[%s2127_s1 + $0x28] sm:$0xff]  }
 0x110   : > { %1511 = vmatprep.subr.bf16.mxu1 %v1752_v2 }
 0x113   : > { %1512 = vmatpush3.bf16.msra.mxu1 %v1664_v39  ;;  %v1695_v39 = vld [vmem:[%s2127_s1 + $0x20] sm:$0xff]  }
 0x114   : > { %1513 = vmatprep.subr.bf16.mxu1 %v1752_v2 }
 0x117   : > { %1514 = vmatpush3.bf16.msra.mxu1 %v1665_v48 }
 0x118   : > { %1515 = vmatprep.subr.bf16.mxu1 %v1752_v2 }
 0x11b   : > { %1516 = vmatpush3.bf16.msra.mxu1 %v1666_v49  ;;  %v1697_v49 = vld [vmem:[%s2127_s1 + $0x10] sm:$0xff]  }
 0x11c   : > { %1517 = vmatprep.subr.bf16.mxu1 %v1752_v2 }
 0x11f   : > { %1518 = vmatpush3.bf16.msra.mxu1 %v1667_v50  ;;  %v1698_v50 = vld [vmem:[%s2127_s1 + $0x8] sm:$0xff]  }
 0x120   : > { %1543 = vmatprep.subr.bf16.mxu1 %v1752_v2 }
 0x1c2   : > { %v473_v41 = vpop.f32.mrf.mxu1 }
 0x1c3   : > { %v479_v42 = vadd.f32 %v1298_v40, %v473_v41  ;;  %v1696_v40 = vld [vmem:[%s2127_s1 + $0x18] sm:$0xff]   ;;  %v1338_v41 = vld [vmem:[%s1802_s25 + $0x28] sm:$0xff] }
 0x1c4   : > { %v1481_v43 = vpop.f32.mrf.mxu1 }
 0x1c5   : > { %v480_v44 = vpack.c.bf16 %v479_v42, %v479_v42 }
 0x1c6   : > { %v476_v45 = vpop.f32.mrf.mxu1 }
 0x1c7   : > { %481 = vst [vmem:[#allocation2] sm:$0xf] %v480_v44 }
 0x1c8   : > { %v1482_v46 = vpop.f32.mrf.mxu1 }
 0x1ce   : > { %v482_v47 = vld [vmem:[#allocation2] sm:$0xf] }
 0x1cf   : > { %1307 = vst [vmem:[%s1807_s28 + $0x8] sm:$0xf] %v482_v47  ;;  %1500 = vmatmul.mubr.bf16.vlgmr.msra.gmra.mxu0 %v482_v47 }
 0x1d0   : > { %1539 = vmatprep.mubr.msk.bf16.mxu0 %vm1753_vm0, %v1752_v2  ;;  %1524 = vmatpush3.bf16.msra.mxu0 %v1668_v51  ;;  %v1699_v51 = vld [vmem:[%s2127_s1] sm:$0xff]  }
 0x1d1   : > { %1525 = vmatprep.subr.bf16.mxu0 %v1752_v2 }
 0x1d4   : > { %1526 = vmatpush3.bf16.msra.mxu0 %v1669_v52  ;;  %v1348_v52 = vld [vmem:[%s1802_s25 + $0x30] sm:$0xff] }
 0x1d5   : > { %1527 = vmatprep.subr.bf16.mxu0 %v1752_v2 }
 0x1d8   : > { %1528 = vmatpush3.bf16.msra.mxu0 %v1670_v53 }
 0x1d9   : > { %1529 = vmatprep.subr.bf16.mxu0 %v1752_v2 }
 0x1dc   : > { %1530 = vmatpush3.bf16.msra.mxu0 %v1671_v54 }
 0x1dd   : > { %1531 = vmatprep.subr.bf16.mxu0 %v1752_v2 }
 0x1e0   : > { %1532 = vmatpush3.bf16.msra.mxu0 %v1672_v55 }
 0x1e1   : > { %1533 = vmatprep.subr.bf16.mxu0 %v1752_v2 }
 0x1e4   : > { %1534 = vmatpush3.bf16.msra.mxu0 %v1673_v0 }
 0x1e5   : > { %1535 = vmatprep.subr.bf16.mxu0 %v1752_v2 }
 0x1e8   : > { %1536 = vmatpush3.bf16.msra.mxu0 %v1674_v1 }
 0x1e9   : > { %1537 = vmatprep.subr.bf16.mxu0 %v1752_v2 }
 0x1ec   : > { %1538 = vmatpush3.bf16.msra.mxu0 %v1675_v3 }
 0x1ed   : > { %1563 = vmatprep.subr.bf16.mxu0 %v1752_v2 }
 0x28f   : > { %v585_v57 = vpop.f32.mrf.mxu0 }
 0x290   : > { %v591_v58 = vadd.f32 %v1308_v56, %v585_v57 }
 0x291   : > { %v1501_v59 = vpop.f32.mrf.mxu0 }
 0x292   : > { %v592_v60 = vpack.c.bf16 %v591_v58, %v591_v58 }
 0x293   : > { %v588_v61 = vpop.f32.mrf.mxu0 }
 0x294   : > { %593 = vst [vmem:[#allocation2] sm:$0xf] %v592_v60  ;;  %v1358_v60 = vld [vmem:[%s1802_s25 + $0x38] sm:$0xff]  ;;  %s1700_s25 = scalar_lea.vmem %s1179_s14, 128 }
 0x295   : > { %v1502_v62 = vpop.f32.mrf.mxu0  ;;  %p1701_p7 = scmp.ne.s32.totalorder %s1179_s14, %s1700_s25  ;;  %p1708_p11 = scmp.lt.s32.totalorder %s1700_s25, %s1700_s25 }
 0x297   : > { %p1702_p8 = pnand %p1701_p7, %p2102_p6  ;;  %p1709_p12 = por %p1708_p11, %p1707_p10 }
 0x299   : > { %p1703_p9 = pneg %p1702_p8 }
 0x29b   : > { %v594_v63 = vld [vmem:[#allocation2] sm:$0xf]  ;;  %p1710_p13 = pnand %p1709_p12, %p1703_p9 }
 0x29c   : > { %1317 = vst [vmem:[%s1807_s28 + $0xc] sm:$0xf] %v594_v63  ;;  %1520 = vmatmul.mubr.bf16.vlgmr.msra.gmra.mxu1 %v594_v63 }
 0x29d   : > { %1559 = vmatprep.mubr.msk.bf16.mxu1 %vm1753_vm0, %v1752_v2  ;;  %1544 = vmatpush3.bf16.msra.mxu1 %v1676_v4 }
 0x29e   : > { %1545 = vmatprep.subr.bf16.mxu1 %v1752_v2 }
 0x2a1   : > { %1546 = vmatpush3.bf16.msra.mxu1 %v1677_v5 }
 0x2a2   : > { %1547 = vmatprep.subr.bf16.mxu1 %v1752_v2 }
 0x2a5   : > { %1548 = vmatpush3.bf16.msra.mxu1 %v1678_v6 }
 0x2a6   : > { %1549 = vmatprep.subr.bf16.mxu1 %v1752_v2 }
 0x2a9   : > { %1550 = vmatpush3.bf16.msra.mxu1 %v1679_v7 }
 0x2aa   : > { %1551 = vmatprep.subr.bf16.mxu1 %v1752_v2 }
 0x2ad   : > { %1552 = vmatpush3.bf16.msra.mxu1 %v1680_v8 }
 0x2ae   : > { %1553 = vmatprep.subr.bf16.mxu1 %v1752_v2 }
 0x2b1   : > { %1554 = vmatpush3.bf16.msra.mxu1 %v1681_v17 }
 0x2b2   : > { %1555 = vmatprep.subr.bf16.mxu1 %v1752_v2 }
 0x2b5   : > { %1556 = vmatpush3.bf16.msra.mxu1 %v1682_v18 }
 0x2b6   : > { %1557 = vmatprep.subr.bf16.mxu1 %v1752_v2 }
 0x2b9   : > { %1558 = vmatpush3.bf16.msra.mxu1 %v1683_v19 }
 0x2ba   : > { %1583 = vmatprep.subr.bf16.mxu1 %v1752_v2 }
 0x35c   : > { %v697_v10 = vpop.f32.mrf.mxu1 }
 0x35d   : > { %v703_v11 = vadd.f32 %v1318_v9, %v697_v10 }
 0x35e   : > { %v1521_v12 = vpop.f32.mrf.mxu1 }
 0x35f   : > { %v704_v13 = vpack.c.bf16 %v703_v11, %v703_v11 }
 0x360   : > { %v700_v14 = vpop.f32.mrf.mxu1 }
 0x361   : > { %705 = vst [vmem:[#allocation2] sm:$0xf] %v704_v13 }
 0x362   : > { %v1522_v15 = vpop.f32.mrf.mxu1 }
 0x368   : > { %v706_v16 = vld [vmem:[#allocation2] sm:$0xf] }
 0x369   : > { %1327 = vst [vmem:[%s1807_s28 + $0x10] sm:$0xf] %v706_v16  ;;  %1540 = vmatmul.mubr.bf16.vlgmr.msra.gmra.mxu0 %v706_v16 }
 0x36a   : > { %1579 = vmatprep.mubr.msk.bf16.mxu0 %vm1753_vm0, %v1752_v2  ;;  %1564 = vmatpush3.bf16.msra.mxu0 %v1684_v20 }
 0x36b   : > { %1565 = vmatprep.subr.bf16.mxu0 %v1752_v2 }
 0x36e   : > { %1566 = vmatpush3.bf16.msra.mxu0 %v1685_v21 }
 0x36f   : > { %1567 = vmatprep.subr.bf16.mxu0 %v1752_v2 }
 0x372   : > { %1568 = vmatpush3.bf16.msra.mxu0 %v1686_v22 }
 0x373   : > { %1569 = vmatprep.subr.bf16.mxu0 %v1752_v2 }
 0x376   : > { %1570 = vmatpush3.bf16.msra.mxu0 %v1687_v23 }
 0x377   : > { %1571 = vmatprep.subr.bf16.mxu0 %v1752_v2 }
 0x37a   : > { %1572 = vmatpush3.bf16.msra.mxu0 %v1688_v24 }
 0x37b   : > { %1573 = vmatprep.subr.bf16.mxu0 %v1752_v2 }
 0x37e   : > { %1574 = vmatpush3.bf16.msra.mxu0 %v1689_v33 }
 0x37f   : > { %1575 = vmatprep.subr.bf16.mxu0 %v1752_v2 }
 0x382   : > { %1576 = vmatpush3.bf16.msra.mxu0 %v1690_v34 }
 0x383   : > { %1577 = vmatprep.subr.bf16.mxu0 %v1752_v2 }
 0x386   : > { %1578 = vmatpush3.bf16.msra.mxu0 %v1691_v35 }
 0x429   : > { %v809_v26 = vpop.f32.mrf.mxu0 }
 0x42a   : > { %v815_v27 = vadd.f32 %v1328_v25, %v809_v26 }
 0x42b   : > { %v1541_v28 = vpop.f32.mrf.mxu0 }
 0x42c   : > { %v816_v29 = vpack.c.bf16 %v815_v27, %v815_v27 }
 0x42d   : > { %v812_v30 = vpop.f32.mrf.mxu0 }
 0x42e   : > { %817 = vst [vmem:[#allocation2] sm:$0xf] %v816_v29 }
 0x42f   : > { %v1542_v31 = vpop.f32.mrf.mxu0 }
 0x435   : > { %v818_v32 = vld [vmem:[#allocation2] sm:$0xf] }
 0x436   : > { %1337 = vst [vmem:[%s1807_s28 + $0x14] sm:$0xf] %v818_v32  ;;  %1560 = vmatmul.mubr.bf16.vlgmr.msra.gmra.mxu1 %v818_v32 }
 0x437   : > { %1599 = vmatprep.mubr.msk.bf16.mxu1 %vm1753_vm0, %v1752_v2  ;;  %1584 = vmatpush3.bf16.msra.mxu1 %v1692_v36 }
 0x438   : > { %1585 = vmatprep.subr.bf16.mxu1 %v1752_v2 }
 0x43b   : > { %1586 = vmatpush3.bf16.msra.mxu1 %v1693_v37 }
 0x43c   : > { %1587 = vmatprep.subr.bf16.mxu1 %v1752_v2 }
 0x43f   : > { %1588 = vmatpush3.bf16.msra.mxu1 %v1694_v38 }
 0x440   : > { %1589 = vmatprep.subr.bf16.mxu1 %v1752_v2 }
 0x443   : > { %1590 = vmatpush3.bf16.msra.mxu1 %v1695_v39 }
 0x444   : > { %1591 = vmatprep.subr.bf16.mxu1 %v1752_v2 }
 0x447   : > { %1592 = vmatpush3.bf16.msra.mxu1 %v1696_v40 }
 0x448   : > { %1593 = vmatprep.subr.bf16.mxu1 %v1752_v2 }
 0x44b   : > { %1594 = vmatpush3.bf16.msra.mxu1 %v1697_v49 }
 0x44c   : > { %1595 = vmatprep.subr.bf16.mxu1 %v1752_v2 }
 0x44f   : > { %1596 = vmatpush3.bf16.msra.mxu1 %v1698_v50 }
 0x450   : > { %1597 = vmatprep.subr.bf16.mxu1 %v1752_v2 }
 0x453   : > { %1598 = vmatpush3.bf16.msra.mxu1 %v1699_v51 }
 0x4f6   : > { %v921_v42 = vpop.f32.mrf.mxu1 }
 0x4f7   : > { %v927_v43 = vadd.f32 %v1338_v41, %v921_v42 }
 0x4f8   : > { %v1561_v44 = vpop.f32.mrf.mxu1 }
 0x4f9   : > { %v928_v45 = vpack.c.bf16 %v927_v43, %v927_v43 }
 0x4fa   : > { %v924_v46 = vpop.f32.mrf.mxu1 }
 0x4fb   : > { %929 = vst [vmem:[#allocation2] sm:$0xf] %v928_v45 }
 0x4fc   : > { %v1562_v47 = vpop.f32.mrf.mxu1 }
 0x502   : > { %v930_v48 = vld [vmem:[#allocation2] sm:$0xf] }
 0x503   : > { %1347 = vst [vmem:[%s1807_s28 + $0x18] sm:$0xf] %v930_v48  ;;  %1580 = vmatmul.mubr.bf16.vlgmr.msra.gmra.mxu0 %v930_v48 }
 0x5c3   : > { %v1033_v53 = vpop.f32.mrf.mxu0 }
 0x5c4   : > { %v1039_v54 = vadd.f32 %v1348_v52, %v1033_v53 }
 0x5c5   : > { %v1581_v55 = vpop.f32.mrf.mxu0 }
 0x5c6   : > { %v1040_v56 = vpack.c.bf16 %v1039_v54, %v1039_v54 }
 0x5c7   : > { %v1036_v57 = vpop.f32.mrf.mxu0 }
 0x5c8   : > { %1041 = vst [vmem:[#allocation2] sm:$0xf] %v1040_v56 }
 0x5c9   : > { %v1582_v58 = vpop.f32.mrf.mxu0 }
 0x5cf   : > { %v1042_v59 = vld [vmem:[#allocation2] sm:$0xf] }
 0x5d0   : > { %1357 = vst [vmem:[%s1807_s28 + $0x1c] sm:$0xf] %v1042_v59  ;;  %1600 = vmatmul.mubr.bf16.vlgmr.msra.gmra.mxu1 %v1042_v59 }
 0x690   : > { %v1145_v61 = vpop.f32.mrf.mxu1 }
 0x691   : > { %v1151_v62 = vadd.f32 %v1358_v60, %v1145_v61 }
 0x692   : > { %v1601_v63 = vpop.f32.mrf.mxu1 }
 0x693   : > { %v1152_v0 = vpack.c.bf16 %v1151_v62, %v1151_v62 }
 0x694   : > { %v1148_v1 = vpop.f32.mrf.mxu1 }
 0x695   : > { %1153 = vst [vmem:[#allocation2] sm:$0xf] %v1152_v0 }
 0x696   : > { %v1602_v2 = vpop.f32.mrf.mxu1 }
 0x69c   : > { %v1154_v3 = vld [vmem:[#allocation2] sm:$0xf] }
 0x69d   : > { %v1155_v4 = vunpack.c.l.bf16 %v1154_v3 }
 0x69f   : > { %1156 = vst [vmem:[#allocation3] sm:$0xff] %v1155_v4 }
 0x6a0   : > { %1713 = shalt.err (!%p1710_p13)
}
 0x6a1   : > { %1604 = dma.vmem_to_hbm [thread:$0]  (%p2102_p6), %s1179_s14, 128, %s2130_s4, [#allocation4]  }
 0x6a2   : > { %1737 = dma.done.wait (%p2102_p6), [#allocation4], 128  }
 0x6a3   : > { %1739 = vsyncadd (%p2102_p6), [#allocation4], 4294967168 }
 0x6a4 PF: > { %s16_s17 = sadd.s32 1, %s1750_s17   ;;  %s2132_s15 = smov %s1746_s16 }
 0x6a5   : > { %p13_p0 = scmp.ge.s32.totalorder %s16_s17, 4   ;;  %s2133_s16 = smov %s2135_s19 }
 0x6a7   :  { %15 = sbr.rel (!%p13_p0) target bundleno = 2 (0x2), region = 93 }
 0x6ac   :  { %1202 = vsyncpa [#allocation4], 1 }
 0x6ad   :  { %1204 = vsyncpa [#allocation4 + $0x1], 1 }

</bundles_post_ra>
